<compile_context>
chip_gen: v5e
topology: v5e:2x2
jax: 0.10.0
libtpu: 0.0.40
codegen_flags: <defaults>
</compile_context>

<pallas_src>
import jax
import jax.numpy as jnp
from jax import lax
from jax.experimental import pallas as pl
from jax.experimental.pallas import tpu as pltpu

# ----------------------------- dimensions -----------------------------------
T = 8            # sequence length
B = 8            # batch size
ACTION_DIM = 2
STATE_DIM = 2
REWARD_SIZE = 1
ACTION_EMB = 10
STATE_EMB = 10
REWARD_EMB = 5
HIDDEN = 64
LATENT = 32
RAW_DIM = ACTION_DIM + STATE_DIM + REWARD_SIZE      # 5
EMB_DIM = ACTION_EMB + STATE_EMB + REWARD_EMB       # 25
OUT_PACK = HIDDEN + 2 * LATENT                      # 128 (lane-dense output width)

# Row layout of the 192-lane weight slab: [ W_in (25) | b_in (1) | W_h (64) ]
ROW_WIN = 0
ROW_BIN = EMB_DIM                   # 25
ROW_WH = EMB_DIM + 1                # 26
W192_ROWS = EMB_DIM + 1 + HIDDEN    # 90

# Row layout of the 128-lane weight slab:
# [ W_big (64) | b_big (1) | bhn (1) | W_feat (5, lanes 0:25) | b_feat (1, lanes 0:25) ]
ROW_WBIG = 0
ROW_BBIG = HIDDEN                   # 64
ROW_BHN = HIDDEN + 1                # 65
ROW_WFEAT = HIDDEN + 2              # 66
ROW_BFEAT = HIDDEN + 2 + RAW_DIM    # 71
W128_ROWS = HIDDEN + 2 + RAW_DIM + 1  # 72


# ------------------------------- kernel -------------------------------------
def rnn_encoder_kernel(asr_ref, h0_ref, w192_ref, w128_ref, out_ref):
    # ---- batched, time-independent prologue (T*B = 64 rows per MXU issue) ----
    asr = asr_ref[...]                                              # (T*B, 5)
    w_feat = w128_ref[ROW_WFEAT:ROW_WFEAT + RAW_DIM, 0:EMB_DIM]     # (5, 25)
    b_feat = w128_ref[ROW_BFEAT:ROW_BFEAT + 1, 0:EMB_DIM]           # (1, 25)
    # relu(Linear) for actions/states/rewards, fused as one block-diagonal matmul.
    feat = jnp.maximum(
        jnp.dot(asr, w_feat, preferred_element_type=jnp.float32) + b_feat, 0.0)  # (T*B, 25)
    # Input projection for ALL timesteps: X @ [Wir|Wiz|Win] + [bir+bhr|biz+bhz|bin].
    xproj = (jnp.dot(feat, w192_ref[ROW_WIN:ROW_WIN + EMB_DIM, :],
                     preferred_element_type=jnp.float32)
             + w192_ref[ROW_BIN:ROW_BIN + 1, :])                    # (T*B, 192)

    # ---- loop-invariant hoists (done ONCE, not per unrolled step) ----
    wh_bf16 = w192_ref[ROW_WH:ROW_WH + HIDDEN, :].astype(jnp.bfloat16)        # (64, 192)
    w_big = w128_ref[ROW_WBIG:ROW_WBIG + HIDDEN, :]                           # (64, 128) = [I|Wmu|Wlv]
    b_big_b = jnp.broadcast_to(w128_ref[ROW_BBIG:ROW_BBIG + 1, :], (B, OUT_PACK))
    bhn_b = jnp.broadcast_to(w128_ref[ROW_BHN:ROW_BHN + 1, 0:HIDDEN], (B, HIDDEN))

    # ---- serial GRU recurrence, fully unrolled at trace time (T = 8) ----
    h = h0_ref[...]                                                 # (B, 64) f32
    for t in range(T):                                              # static -> unrolled
        xp = xproj[t * B:(t + 1) * B, :]                            # static slice (B, 192)
        # Single-pass bf16 MXU matmul on the serial critical path, f32 accumulation.
        hh = jnp.dot(h.astype(jnp.bfloat16), wh_bf16,
                     preferred_element_type=jnp.float32)            # (B, 192)
        # One full-vreg (128-lane) sigmoid for both r and z gates (one EUP push).
        rz = jax.nn.sigmoid(xp[:, 0:2 * HIDDEN] + hh[:, 0:2 * HIDDEN])
        r = rz[:, 0:HIDDEN]
        z = rz[:, HIDDEN:2 * HIDDEN]
        n = jnp.tanh(xp[:, 2 * HIDDEN:] + r * (hh[:, 2 * HIDDEN:] + bhn_b))
        h = n + z * (h - n)                                         # == (1-z)*n + z*h
        # Identity-augmented head: [h | mu | logvar] -> one unmasked 128-lane-dense store.
        out_ref[t * B:(t + 1) * B, :] = (
            jnp.dot(h, w_big, preferred_element_type=jnp.float32) + b_big_b)


# ------------------------- host-side weight packing (ONCE at init) ----------
def pack_rnn_encoder_params(params):
    f32 = jnp.float32
    # Block-diagonal feature-extractor weight: [a|s|r] @ blockdiag(Wa,Ws,Wr) = [ha|hs|hr].
    w_feat = jnp.zeros((RAW_DIM, EMB_DIM), dtype=f32)
    w_feat = w_feat.at[0:ACTION_DIM, 0:ACTION_EMB].set(params["wa"])
    w_feat = w_feat.at[ACTION_DIM:ACTION_DIM + STATE_DIM,
                       ACTION_EMB:ACTION_EMB + STATE_EMB].set(params["ws"])
    w_feat = w_feat.at[ACTION_DIM + STATE_DIM:,
                       ACTION_EMB + STATE_EMB:].set(params["wr"])
    b_feat = jnp.concatenate([params["ba"], params["bs"], params["br"]], axis=-1)  # (1, 25)

    # GRU input/hidden weights packed per gate group (r, z, n); bir+bhr and biz+bhz pre-summed,
    # bhn kept separate (it sits inside r * (...)).
    w_in = jnp.concatenate([params["wir"], params["wiz"], params["win"]], axis=-1)  # (25, 192)
    b_in = jnp.concatenate([params["bir"] + params["bhr"],
                            params["biz"] + params["bhz"],
                            params["bin"]], axis=-1)                                # (1, 192)
    w_h = jnp.concatenate([params["whr"], params["whz"], params["whn"]], axis=-1)   # (64, 192)
    w192 = jnp.concatenate([w_in, b_in, w_h], axis=0).astype(f32)                   # (90, 192)

    # Identity-augmented head: out = h @ [I | Wmu | Wlv] + [0 | bmu | blv] = [h | mu | logvar].
    w_big = jnp.concatenate([jnp.eye(HIDDEN, dtype=f32), params["wmu"], params["wlv"]],
                            axis=-1)                                                # (64, 128)
    b_big = jnp.concatenate([jnp.zeros((1, HIDDEN), f32), params["bmu"], params["blv"]],
                            axis=-1)                                                # (1, 128)
    bhn_row = jnp.pad(params["bhn"], ((0, 0), (0, OUT_PACK - HIDDEN)))              # (1, 128)
    w_feat_rows = jnp.pad(w_feat, ((0, 0), (0, OUT_PACK - EMB_DIM)))                # (5, 128)
    b_feat_row = jnp.pad(b_feat, ((0, 0), (0, OUT_PACK - EMB_DIM)))                 # (1, 128)
    w128 = jnp.concatenate([w_big, b_big, bhn_row, w_feat_rows, b_feat_row],
                           axis=0).astype(f32)                                      # (72, 128)
    assert w192.shape == (W192_ROWS, 3 * HIDDEN)
    assert w128.shape == (W128_ROWS, OUT_PACK)
    return w192, w128


# ------------------------------ wrapper --------------------------------------
def rnn_encoder_forward(actions, states, rewards, hidden_state, packed_weights, *, sample_key):
    w192, w128 = packed_weights
    Tn, Bn = actions.shape[0], actions.shape[1]

    # Raw inputs concatenated along features: (T*B, 5).
    asr = jnp.concatenate([actions, states, rewards], axis=-1).reshape(Tn * Bn, RAW_DIM)
    h0 = hidden_state[0]                                            # (B, HIDDEN)

    vmem = pl.BlockSpec(memory_space=pltpu.MemorySpace.VMEM)        # whole arrays, VMEM-resident
    packed = pl.pallas_call(
        rnn_encoder_kernel,
        out_shape=jax.ShapeDtypeStruct((Tn * Bn, OUT_PACK), jnp.float32),
        in_specs=[vmem] * 4,
        out_specs=vmem,
    )(asr, h0, w192, w128)

    output = packed[:, :HIDDEN].reshape(Tn, Bn, HIDDEN)
    latent_mean = packed[:, HIDDEN:HIDDEN + LATENT].reshape(Tn, Bn, LATENT)
    latent_logvar = packed[:, HIDDEN + LATENT:].reshape(Tn, Bn, LATENT)

    # Reparameterization (glue, elementwise): eps * std + mu.
    std = jnp.exp(0.5 * latent_logvar)
    eps = jax.random.normal(sample_key, std.shape, dtype=std.dtype)
    latent_sample = eps * std + latent_mean
    return latent_sample, latent_mean, latent_logvar, output


# -------------------------- pure-JAX reference -------------------------------
def reference_forward(actions, states, rewards, hidden_state, p):
    relu = jax.nn.relu
    ha = relu(actions @ p["wa"] + p["ba"])
    hs = relu(states @ p["ws"] + p["bs"])
    hr = relu(rewards @ p["wr"] + p["br"])
    x = jnp.concatenate([ha, hs, hr], axis=-1)

    def step(h, xt):
        r = jax.nn.sigmoid(xt @ p["wir"] + p["bir"] + h @ p["whr"] + p["bhr"])
        z = jax.nn.sigmoid(xt @ p["wiz"] + p["biz"] + h @ p["whz"] + p["bhz"])
        n = jnp.tanh(xt @ p["win"] + p["bin"] + r * (h @ p["whn"] + p["bhn"]))
        h_new = (1.0 - z) * n + z * h
        return h_new, h_new

    _, outs = lax.scan(step, hidden_state[0], x)
    mu = outs @ p["wmu"] + p["bmu"]
    lv = outs @ p["wlv"] + p["blv"]
    return outs, mu, lv


# --------------------------------- main ---------------------------------------
if __name__ == "__main__":
    key = jax.random.PRNGKey(0)
    ks = jax.random.split(key, 40)

    def lin(kw, kb, din, dout, scale=0.3):
        w = scale * jax.random.normal(kw, (din, dout), dtype=jnp.float32)
        b = scale * jax.random.normal(kb, (1, dout), dtype=jnp.float32)
        return w, b

    params = {}
    params["wa"], params["ba"] = lin(ks[0], ks[1], ACTION_DIM, ACTION_EMB)
    params["ws"], params["bs"] = lin(ks[2], ks[3], STATE_DIM, STATE_EMB)
    params["wr"], params["br"] = lin(ks[4], ks[5], REWARD_SIZE, REWARD_EMB)

    # GRU weights: orthogonal-ish init approximated with scaled normals.
    # NOTE: the module zero-initializes GRU biases; we use small NONZERO biases so the
    # bias-fusion path (bir+bhr / biz+bhz pre-sum, bhn kept inside r*(...)) is actually
    # exercised by the correctness checks (forward semantics are identical either way).
    for name, k, din in (("wir", ks[6], EMB_DIM), ("wiz", ks[7], EMB_DIM),
                         ("win", ks[8], EMB_DIM), ("whr", ks[9], HIDDEN),
                         ("whz", ks[10], HIDDEN), ("whn", ks[11], HIDDEN)):
        params[name] = (1.0 / jnp.sqrt(jnp.float32(din))) * jax.random.normal(
            k, (din, HIDDEN), dtype=jnp.float32)
    for i, name in enumerate(("bir", "biz", "bin", "bhr", "bhz", "bhn")):
        params[name] = 0.1 * jax.random.normal(ks[20 + i], (1, HIDDEN), dtype=jnp.float32)

    params["wmu"], params["bmu"] = lin(ks[12], ks[13], HIDDEN, LATENT, scale=0.1)
    params["wlv"], params["blv"] = lin(ks[14], ks[15], HIDDEN, LATENT, scale=0.1)

    actions = jax.random.normal(ks[16], (T, B, ACTION_DIM), dtype=jnp.float32)
    states = jax.random.normal(ks[17], (T, B, STATE_DIM), dtype=jnp.float32)
    rewards = jax.random.normal(ks[18], (T, B, REWARD_SIZE), dtype=jnp.float32)
    hidden_state = 0.1 * jax.random.normal(ks[19], (1, B, HIDDEN), dtype=jnp.float32)

    # Fused weight slabs built ONCE (not per forward call).
    packed_weights = pack_rnn_encoder_params(params)
    packed_weights = jax.block_until_ready(packed_weights)

    latent_sample, latent_mean, latent_logvar, output = rnn_encoder_forward(
        actions, states, rewards, hidden_state, packed_weights, sample_key=ks[30])
    jax.block_until_ready((latent_sample, latent_mean, latent_logvar, output))

    # Validate against a pure-JAX f32 reference (unfused weights, lax.scan recurrence).
    # Tolerance is loosened vs. the previous version because the kernel runs the serial
    # recurrence matmul (h @ W_h) in bf16 on the MXU (f32 accumulation); gate math stays f32.
    ref_out, ref_mu, ref_lv = reference_forward(actions, states, rewards,
                                                hidden_state, params)
    assert jnp.allclose(output, ref_out, atol=5e-2, rtol=5e-2)
    assert jnp.allclose(latent_mean, ref_mu, atol=5e-2, rtol=5e-2)
    assert jnp.allclose(latent_logvar, ref_lv, atol=5e-2, rtol=5e-2)

    # TODO(synk): PyTorch module runs in float64; TPU kernel uses f32 (+ bf16 MXU recurrence).
    print("KERNEL_OK")
</pallas_src>

<mosaic_0001>
module attributes {stable_mosaic.version = 11 : i64} {
  func.func @rnn_encoder_kernel(%arg0: memref<64x5xf32, #tpu.memory_space<vmem>>, %arg1: memref<8x64xf32, #tpu.memory_space<vmem>>, %arg2: memref<90x192xf32, #tpu.memory_space<vmem>>, %arg3: memref<72x128xf32, #tpu.memory_space<vmem>>, %arg4: memref<64x128xf32, #tpu.memory_space<vmem>>) attributes {dimension_semantics = [], scalar_prefetch = 0 : i64, scratch_operands = 0 : i64, tpu.core_type = #tpu.core_type<tc>} {
    %c0 = arith.constant 0 : index
    %c0_0 = arith.constant 0 : index
    %0 = vector.load %arg0[%c0, %c0_0] : memref<64x5xf32, #tpu.memory_space<vmem>>, vector<64x5xf32>
    %c66 = arith.constant 66 : index
    %c0_1 = arith.constant 0 : index
    %1 = vector.load %arg3[%c66, %c0_1] : memref<72x128xf32, #tpu.memory_space<vmem>>, vector<5x25xf32>
    %c71 = arith.constant 71 : index
    %c0_2 = arith.constant 0 : index
    %2 = vector.load %arg3[%c71, %c0_2] : memref<72x128xf32, #tpu.memory_space<vmem>>, vector<1x25xf32>
    %cst = arith.constant dense<0.000000e+00> : vector<64x25xf32>
    %3 = tpu.matmul %0, %1, %cst {dimension_numbers = #tpu.dot_dimension_numbers<[1], [0], [0], [1], [0, 0, 1, 1], [], []>} : vector<64x5xf32>, vector<5x25xf32>, vector<64x25xf32> -> vector<64x25xf32>
    %4 = vector.broadcast %2 : vector<1x25xf32> to vector<64x25xf32>
    %5 = arith.addf %3, %4 : vector<64x25xf32>
    %cst_3 = arith.constant 0.000000e+00 : f32
    %6 = vector.broadcast %cst_3 : f32 to vector<64x25xf32>
    %7 = arith.maximumf %5, %6 : vector<64x25xf32>
    %c0_4 = arith.constant 0 : index
    %c0_5 = arith.constant 0 : index
    %8 = vector.load %arg2[%c0_4, %c0_5] : memref<90x192xf32, #tpu.memory_space<vmem>>, vector<25x192xf32>
    %cst_6 = arith.constant dense<0.000000e+00> : vector<64x192xf32>
    %9 = tpu.matmul %7, %8, %cst_6 {dimension_numbers = #tpu.dot_dimension_numbers<[1], [0], [0], [1], [0, 0, 1, 1], [], []>} : vector<64x25xf32>, vector<25x192xf32>, vector<64x192xf32> -> vector<64x192xf32>
    %c25 = arith.constant 25 : index
    %c0_7 = arith.constant 0 : index
    %10 = vector.load %arg2[%c25, %c0_7] : memref<90x192xf32, #tpu.memory_space<vmem>>, vector<1x192xf32>
    %11 = vector.broadcast %10 : vector<1x192xf32> to vector<64x192xf32>
    %12 = arith.addf %9, %11 : vector<64x192xf32>
    %c26 = arith.constant 26 : index
    %c0_8 = arith.constant 0 : index
    %13 = vector.load %arg2[%c26, %c0_8] : memref<90x192xf32, #tpu.memory_space<vmem>>, vector<64x192xf32>
    %14 = arith.truncf %13 : vector<64x192xf32> to vector<64x192xbf16>
    %c0_9 = arith.constant 0 : index
    %c0_10 = arith.constant 0 : index
    %15 = vector.load %arg3[%c0_9, %c0_10] : memref<72x128xf32, #tpu.memory_space<vmem>>, vector<64x128xf32>
    %c64 = arith.constant 64 : index
    %c0_11 = arith.constant 0 : index
    %16 = vector.load %arg3[%c64, %c0_11] : memref<72x128xf32, #tpu.memory_space<vmem>>, vector<1x128xf32>
    %17 = vector.shape_cast %16 : vector<1x128xf32> to vector<1x128xf32>
    %18 = vector.broadcast %17 : vector<1x128xf32> to vector<8x128xf32>
    %c65 = arith.constant 65 : index
    %c0_12 = arith.constant 0 : index
    %19 = vector.load %arg3[%c65, %c0_12] : memref<72x128xf32, #tpu.memory_space<vmem>>, vector<1x64xf32>
    %20 = vector.shape_cast %19 : vector<1x64xf32> to vector<1x64xf32>
    %21 = vector.broadcast %20 : vector<1x64xf32> to vector<8x64xf32>
    %c0_13 = arith.constant 0 : index
    %c0_14 = arith.constant 0 : index
    %22 = vector.load %arg1[%c0_13, %c0_14] : memref<8x64xf32, #tpu.memory_space<vmem>>, vector<8x64xf32>
    %23 = vector.extract_strided_slice %12 {offsets = [0, 0], sizes = [8, 192], strides = [1, 1]} : vector<64x192xf32> to vector<8x192xf32>
    %24 = arith.truncf %22 : vector<8x64xf32> to vector<8x64xbf16>
    %cst_15 = arith.constant dense<0.000000e+00> : vector<8x192xf32>
    %25 = tpu.matmul %24, %14, %cst_15 {dimension_numbers = #tpu.dot_dimension_numbers<[1], [0], [0], [1], [0, 0, 1, 1], [], []>} : vector<8x64xbf16>, vector<64x192xbf16>, vector<8x192xf32> -> vector<8x192xf32>
    %26 = vector.extract_strided_slice %23 {offsets = [0, 0], sizes = [8, 128], strides = [1, 1]} : vector<8x192xf32> to vector<8x128xf32>
    %27 = vector.extract_strided_slice %25 {offsets = [0, 0], sizes = [8, 128], strides = [1, 1]} : vector<8x192xf32> to vector<8x128xf32>
    %28 = arith.addf %26, %27 : vector<8x128xf32>
    %29 = arith.negf %28 : vector<8x128xf32>
    %30 = math.exp %29 : vector<8x128xf32>
    %cst_16 = arith.constant 1.000000e+00 : f32
    %31 = vector.broadcast %cst_16 : f32 to vector<8x128xf32>
    %32 = arith.addf %31, %30 : vector<8x128xf32>
    %33 = arith.divf %31, %32 : vector<8x128xf32>
    %34 = vector.extract_strided_slice %33 {offsets = [0, 0], sizes = [8, 64], strides = [1, 1]} : vector<8x128xf32> to vector<8x64xf32>
    %35 = vector.extract_strided_slice %33 {offsets = [0, 64], sizes = [8, 64], strides = [1, 1]} : vector<8x128xf32> to vector<8x64xf32>
    %36 = vector.extract_strided_slice %23 {offsets = [0, 128], sizes = [8, 64], strides = [1, 1]} : vector<8x192xf32> to vector<8x64xf32>
    %37 = vector.extract_strided_slice %25 {offsets = [0, 128], sizes = [8, 64], strides = [1, 1]} : vector<8x192xf32> to vector<8x64xf32>
    %38 = arith.addf %37, %21 : vector<8x64xf32>
    %39 = arith.mulf %34, %38 : vector<8x64xf32>
    %40 = arith.addf %36, %39 : vector<8x64xf32>
    %41 = math.tanh %40 : vector<8x64xf32>
    %42 = arith.subf %22, %41 : vector<8x64xf32>
    %43 = arith.mulf %35, %42 : vector<8x64xf32>
    %44 = arith.addf %41, %43 : vector<8x64xf32>
    %cst_17 = arith.constant dense<0.000000e+00> : vector<8x128xf32>
    %45 = tpu.matmul %44, %15, %cst_17 {dimension_numbers = #tpu.dot_dimension_numbers<[1], [0], [0], [1], [0, 0, 1, 1], [], []>} : vector<8x64xf32>, vector<64x128xf32>, vector<8x128xf32> -> vector<8x128xf32>
    %46 = arith.addf %45, %18 : vector<8x128xf32>
    %c0_18 = arith.constant 0 : index
    %c0_19 = arith.constant 0 : index
    %47 = vector.load %arg4[%c0_18, %c0_19] : memref<64x128xf32, #tpu.memory_space<vmem>>, vector<8x128xf32>
    tpu.vector_store %arg4[%c0_18, %c0_19], %46 {strides = array<i32>} : memref<64x128xf32, #tpu.memory_space<vmem>>, vector<8x128xf32>,
    %48 = vector.extract_strided_slice %12 {offsets = [8, 0], sizes = [8, 192], strides = [1, 1]} : vector<64x192xf32> to vector<8x192xf32>
    %49 = arith.truncf %44 : vector<8x64xf32> to vector<8x64xbf16>
    %cst_20 = arith.constant dense<0.000000e+00> : vector<8x192xf32>
    %50 = tpu.matmul %49, %14, %cst_20 {dimension_numbers = #tpu.dot_dimension_numbers<[1], [0], [0], [1], [0, 0, 1, 1], [], []>} : vector<8x64xbf16>, vector<64x192xbf16>, vector<8x192xf32> -> vector<8x192xf32>
    %51 = vector.extract_strided_slice %48 {offsets = [0, 0], sizes = [8, 128], strides = [1, 1]} : vector<8x192xf32> to vector<8x128xf32>
    %52 = vector.extract_strided_slice %50 {offsets = [0, 0], sizes = [8, 128], strides = [1, 1]} : vector<8x192xf32> to vector<8x128xf32>
    %53 = arith.addf %51, %52 : vector<8x128xf32>
    %54 = arith.negf %53 : vector<8x128xf32>
    %55 = math.exp %54 : vector<8x128xf32>
    %cst_21 = arith.constant 1.000000e+00 : f32
    %56 = vector.broadcast %cst_21 : f32 to vector<8x128xf32>
    %57 = arith.addf %56, %55 : vector<8x128xf32>
    %58 = arith.divf %56, %57 : vector<8x128xf32>
    %59 = vector.extract_strided_slice %58 {offsets = [0, 0], sizes = [8, 64], strides = [1, 1]} : vector<8x128xf32> to vector<8x64xf32>
    %60 = vector.extract_strided_slice %58 {offsets = [0, 64], sizes = [8, 64], strides = [1, 1]} : vector<8x128xf32> to vector<8x64xf32>
    %61 = vector.extract_strided_slice %48 {offsets = [0, 128], sizes = [8, 64], strides = [1, 1]} : vector<8x192xf32> to vector<8x64xf32>
    %62 = vector.extract_strided_slice %50 {offsets = [0, 128], sizes = [8, 64], strides = [1, 1]} : vector<8x192xf32> to vector<8x64xf32>
    %63 = arith.addf %62, %21 : vector<8x64xf32>
    %64 = arith.mulf %59, %63 : vector<8x64xf32>
    %65 = arith.addf %61, %64 : vector<8x64xf32>
    %66 = math.tanh %65 : vector<8x64xf32>
    %67 = arith.subf %44, %66 : vector<8x64xf32>
    %68 = arith.mulf %60, %67 : vector<8x64xf32>
    %69 = arith.addf %66, %68 : vector<8x64xf32>
    %cst_22 = arith.constant dense<0.000000e+00> : vector<8x128xf32>
    %70 = tpu.matmul %69, %15, %cst_22 {dimension_numbers = #tpu.dot_dimension_numbers<[1], [0], [0], [1], [0, 0, 1, 1], [], []>} : vector<8x64xf32>, vector<64x128xf32>, vector<8x128xf32> -> vector<8x128xf32>
    %71 = arith.addf %70, %18 : vector<8x128xf32>
    %c8 = arith.constant 8 : index
    %c0_23 = arith.constant 0 : index
    %72 = vector.load %arg4[%c8, %c0_23] : memref<64x128xf32, #tpu.memory_space<vmem>>, vector<8x128xf32>
    tpu.vector_store %arg4[%c8, %c0_23], %71 {strides = array<i32>} : memref<64x128xf32, #tpu.memory_space<vmem>>, vector<8x128xf32>,
    %73 = vector.extract_strided_slice %12 {offsets = [16, 0], sizes = [8, 192], strides = [1, 1]} : vector<64x192xf32> to vector<8x192xf32>
    %74 = arith.truncf %69 : vector<8x64xf32> to vector<8x64xbf16>
    %cst_24 = arith.constant dense<0.000000e+00> : vector<8x192xf32>
    %75 = tpu.matmul %74, %14, %cst_24 {dimension_numbers = #tpu.dot_dimension_numbers<[1], [0], [0], [1], [0, 0, 1, 1], [], []>} : vector<8x64xbf16>, vector<64x192xbf16>, vector<8x192xf32> -> vector<8x192xf32>
    %76 = vector.extract_strided_slice %73 {offsets = [0, 0], sizes = [8, 128], strides = [1, 1]} : vector<8x192xf32> to vector<8x128xf32>
    %77 = vector.extract_strided_slice %75 {offsets = [0, 0], sizes = [8, 128], strides = [1, 1]} : vector<8x192xf32> to vector<8x128xf32>
    %78 = arith.addf %76, %77 : vector<8x128xf32>
    %79 = arith.negf %78 : vector<8x128xf32>
    %80 = math.exp %79 : vector<8x128xf32>
    %cst_25 = arith.constant 1.000000e+00 : f32
    %81 = vector.broadcast %cst_25 : f32 to vector<8x128xf32>
    %82 = arith.addf %81, %80 : vector<8x128xf32>
    %83 = arith.divf %81, %82 : vector<8x128xf32>
    %84 = vector.extract_strided_slice %83 {offsets = [0, 0], sizes = [8, 64], strides = [1, 1]} : vector<8x128xf32> to vector<8x64xf32>
    %85 = vector.extract_strided_slice %83 {offsets = [0, 64], sizes = [8, 64], strides = [1, 1]} : vector<8x128xf32> to vector<8x64xf32>
    %86 = vector.extract_strided_slice %73 {offsets = [0, 128], sizes = [8, 64], strides = [1, 1]} : vector<8x192xf32> to vector<8x64xf32>
    %87 = vector.extract_strided_slice %75 {offsets = [0, 128], sizes = [8, 64], strides = [1, 1]} : vector<8x192xf32> to vector<8x64xf32>
    %88 = arith.addf %87, %21 : vector<8x64xf32>
    %89 = arith.mulf %84, %88 : vector<8x64xf32>
    %90 = arith.addf %86, %89 : vector<8x64xf32>
    %91 = math.tanh %90 : vector<8x64xf32>
    %92 = arith.subf %69, %91 : vector<8x64xf32>
    %93 = arith.mulf %85, %92 : vector<8x64xf32>
    %94 = arith.addf %91, %93 : vector<8x64xf32>
    %cst_26 = arith.constant dense<0.000000e+00> : vector<8x128xf32>
    %95 = tpu.matmul %94, %15, %cst_26 {dimension_numbers = #tpu.dot_dimension_numbers<[1], [0], [0], [1], [0, 0, 1, 1], [], []>} : vector<8x64xf32>, vector<64x128xf32>, vector<8x128xf32> -> vector<8x128xf32>
    %96 = arith.addf %95, %18 : vector<8x128xf32>
    %c16 = arith.constant 16 : index
    %c0_27 = arith.constant 0 : index
    %97 = vector.load %arg4[%c16, %c0_27] : memref<64x128xf32, #tpu.memory_space<vmem>>, vector<8x128xf32>
    tpu.vector_store %arg4[%c16, %c0_27], %96 {strides = array<i32>} : memref<64x128xf32, #tpu.memory_space<vmem>>, vector<8x128xf32>,
    %98 = vector.extract_strided_slice %12 {offsets = [24, 0], sizes = [8, 192], strides = [1, 1]} : vector<64x192xf32> to vector<8x192xf32>
    %99 = arith.truncf %94 : vector<8x64xf32> to vector<8x64xbf16>
    %cst_28 = arith.constant dense<0.000000e+00> : vector<8x192xf32>
    %100 = tpu.matmul %99, %14, %cst_28 {dimension_numbers = #tpu.dot_dimension_numbers<[1], [0], [0], [1], [0, 0, 1, 1], [], []>} : vector<8x64xbf16>, vector<64x192xbf16>, vector<8x192xf32> -> vector<8x192xf32>
    %101 = vector.extract_strided_slice %98 {offsets = [0, 0], sizes = [8, 128], strides = [1, 1]} : vector<8x192xf32> to vector<8x128xf32>
    %102 = vector.extract_strided_slice %100 {offsets = [0, 0], sizes = [8, 128], strides = [1, 1]} : vector<8x192xf32> to vector<8x128xf32>
    %103 = arith.addf %101, %102 : vector<8x128xf32>
    %104 = arith.negf %103 : vector<8x128xf32>
    %105 = math.exp %104 : vector<8x128xf32>
    %cst_29 = arith.constant 1.000000e+00 : f32
    %106 = vector.broadcast %cst_29 : f32 to vector<8x128xf32>
    %107 = arith.addf %106, %105 : vector<8x128xf32>
    %108 = arith.divf %106, %107 : vector<8x128xf32>
    %109 = vector.extract_strided_slice %108 {offsets = [0, 0], sizes = [8, 64], strides = [1, 1]} : vector<8x128xf32> to vector<8x64xf32>
    %110 = vector.extract_strided_slice %108 {offsets = [0, 64], sizes = [8, 64], strides = [1, 1]} : vector<8x128xf32> to vector<8x64xf32>
    %111 = vector.extract_strided_slice %98 {offsets = [0, 128], sizes = [8, 64], strides = [1, 1]} : vector<8x192xf32> to vector<8x64xf32>
    %112 = vector.extract_strided_slice %100 {offsets = [0, 128], sizes = [8, 64], strides = [1, 1]} : vector<8x192xf32> to vector<8x64xf32>
    %113 = arith.addf %112, %21 : vector<8x64xf32>
    %114 = arith.mulf %109, %113 : vector<8x64xf32>
    %115 = arith.addf %111, %114 : vector<8x64xf32>
    %116 = math.tanh %115 : vector<8x64xf32>
    %117 = arith.subf %94, %116 : vector<8x64xf32>
    %118 = arith.mulf %110, %117 : vector<8x64xf32>
    %119 = arith.addf %116, %118 : vector<8x64xf32>
    %cst_30 = arith.constant dense<0.000000e+00> : vector<8x128xf32>
    %120 = tpu.matmul %119, %15, %cst_30 {dimension_numbers = #tpu.dot_dimension_numbers<[1], [0], [0], [1], [0, 0, 1, 1], [], []>} : vector<8x64xf32>, vector<64x128xf32>, vector<8x128xf32> -> vector<8x128xf32>
    %121 = arith.addf %120, %18 : vector<8x128xf32>
    %c24 = arith.constant 24 : index
    %c0_31 = arith.constant 0 : index
    %122 = vector.load %arg4[%c24, %c0_31] : memref<64x128xf32, #tpu.memory_space<vmem>>, vector<8x128xf32>
    tpu.vector_store %arg4[%c24, %c0_31], %121 {strides = array<i32>} : memref<64x128xf32, #tpu.memory_space<vmem>>, vector<8x128xf32>,
    %123 = vector.extract_strided_slice %12 {offsets = [32, 0], sizes = [8, 192], strides = [1, 1]} : vector<64x192xf32> to vector<8x192xf32>
    %124 = arith.truncf %119 : vector<8x64xf32> to vector<8x64xbf16>
    %cst_32 = arith.constant dense<0.000000e+00> : vector<8x192xf32>
    %125 = tpu.matmul %124, %14, %cst_32 {dimension_numbers = #tpu.dot_dimension_numbers<[1], [0], [0], [1], [0, 0, 1, 1], [], []>} : vector<8x64xbf16>, vector<64x192xbf16>, vector<8x192xf32> -> vector<8x192xf32>
    %126 = vector.extract_strided_slice %123 {offsets = [0, 0], sizes = [8, 128], strides = [1, 1]} : vector<8x192xf32> to vector<8x128xf32>
    %127 = vector.extract_strided_slice %125 {offsets = [0, 0], sizes = [8, 128], strides = [1, 1]} : vector<8x192xf32> to vector<8x128xf32>
    %128 = arith.addf %126, %127 : vector<8x128xf32>
    %129 = arith.negf %128 : vector<8x128xf32>
    %130 = math.exp %129 : vector<8x128xf32>
    %cst_33 = arith.constant 1.000000e+00 : f32
    %131 = vector.broadcast %cst_33 : f32 to vector<8x128xf32>
    %132 = arith.addf %131, %130 : vector<8x128xf32>
    %133 = arith.divf %131, %132 : vector<8x128xf32>
    %134 = vector.extract_strided_slice %133 {offsets = [0, 0], sizes = [8, 64], strides = [1, 1]} : vector<8x128xf32> to vector<8x64xf32>
    %135 = vector.extract_strided_slice %133 {offsets = [0, 64], sizes = [8, 64], strides = [1, 1]} : vector<8x128xf32> to vector<8x64xf32>
    %136 = vector.extract_strided_slice %123 {offsets = [0, 128], sizes = [8, 64], strides = [1, 1]} : vector<8x192xf32> to vector<8x64xf32>
    %137 = vector.extract_strided_slice %125 {offsets = [0, 128], sizes = [8, 64], strides = [1, 1]} : vector<8x192xf32> to vector<8x64xf32>
    %138 = arith.addf %137, %21 : vector<8x64xf32>
    %139 = arith.mulf %134, %138 : vector<8x64xf32>
    %140 = arith.addf %136, %139 : vector<8x64xf32>
    %141 = math.tanh %140 : vector<8x64xf32>
    %142 = arith.subf %119, %141 : vector<8x64xf32>
    %143 = arith.mulf %135, %142 : vector<8x64xf32>
    %144 = arith.addf %141, %143 : vector<8x64xf32>
    %cst_34 = arith.constant dense<0.000000e+00> : vector<8x128xf32>
    %145 = tpu.matmul %144, %15, %cst_34 {dimension_numbers = #tpu.dot_dimension_numbers<[1], [0], [0], [1], [0, 0, 1, 1], [], []>} : vector<8x64xf32>, vector<64x128xf32>, vector<8x128xf32> -> vector<8x128xf32>
    %146 = arith.addf %145, %18 : vector<8x128xf32>
    %c32 = arith.constant 32 : index
    %c0_35 = arith.constant 0 : index
    %147 = vector.load %arg4[%c32, %c0_35] : memref<64x128xf32, #tpu.memory_space<vmem>>, vector<8x128xf32>
    tpu.vector_store %arg4[%c32, %c0_35], %146 {strides = array<i32>} : memref<64x128xf32, #tpu.memory_space<vmem>>, vector<8x128xf32>,
    %148 = vector.extract_strided_slice %12 {offsets = [40, 0], sizes = [8, 192], strides = [1, 1]} : vector<64x192xf32> to vector<8x192xf32>
    %149 = arith.truncf %144 : vector<8x64xf32> to vector<8x64xbf16>
    %cst_36 = arith.constant dense<0.000000e+00> : vector<8x192xf32>
    %150 = tpu.matmul %149, %14, %cst_36 {dimension_numbers = #tpu.dot_dimension_numbers<[1], [0], [0], [1], [0, 0, 1, 1], [], []>} : vector<8x64xbf16>, vector<64x192xbf16>, vector<8x192xf32> -> vector<8x192xf32>
    %151 = vector.extract_strided_slice %148 {offsets = [0, 0], sizes = [8, 128], strides = [1, 1]} : vector<8x192xf32> to vector<8x128xf32>
    %152 = vector.extract_strided_slice %150 {offsets = [0, 0], sizes = [8, 128], strides = [1, 1]} : vector<8x192xf32> to vector<8x128xf32>
    %153 = arith.addf %151, %152 : vector<8x128xf32>
    %154 = arith.negf %153 : vector<8x128xf32>
    %155 = math.exp %154 : vector<8x128xf32>
    %cst_37 = arith.constant 1.000000e+00 : f32
    %156 = vector.broadcast %cst_37 : f32 to vector<8x128xf32>
    %157 = arith.addf %156, %155 : vector<8x128xf32>
    %158 = arith.divf %156, %157 : vector<8x128xf32>
    %159 = vector.extract_strided_slice %158 {offsets = [0, 0], sizes = [8, 64], strides = [1, 1]} : vector<8x128xf32> to vector<8x64xf32>
    %160 = vector.extract_strided_slice %158 {offsets = [0, 64], sizes = [8, 64], strides = [1, 1]} : vector<8x128xf32> to vector<8x64xf32>
    %161 = vector.extract_strided_slice %148 {offsets = [0, 128], sizes = [8, 64], strides = [1, 1]} : vector<8x192xf32> to vector<8x64xf32>
    %162 = vector.extract_strided_slice %150 {offsets = [0, 128], sizes = [8, 64], strides = [1, 1]} : vector<8x192xf32> to vector<8x64xf32>
    %163 = arith.addf %162, %21 : vector<8x64xf32>
    %164 = arith.mulf %159, %163 : vector<8x64xf32>
    %165 = arith.addf %161, %164 : vector<8x64xf32>
    %166 = math.tanh %165 : vector<8x64xf32>
    %167 = arith.subf %144, %166 : vector<8x64xf32>
    %168 = arith.mulf %160, %167 : vector<8x64xf32>
    %169 = arith.addf %166, %168 : vector<8x64xf32>
    %cst_38 = arith.constant dense<0.000000e+00> : vector<8x128xf32>
    %170 = tpu.matmul %169, %15, %cst_38 {dimension_numbers = #tpu.dot_dimension_numbers<[1], [0], [0], [1], [0, 0, 1, 1], [], []>} : vector<8x64xf32>, vector<64x128xf32>, vector<8x128xf32> -> vector<8x128xf32>
    %171 = arith.addf %170, %18 : vector<8x128xf32>
    %c40 = arith.constant 40 : index
    %c0_39 = arith.constant 0 : index
    %172 = vector.load %arg4[%c40, %c0_39] : memref<64x128xf32, #tpu.memory_space<vmem>>, vector<8x128xf32>
    tpu.vector_store %arg4[%c40, %c0_39], %171 {strides = array<i32>} : memref<64x128xf32, #tpu.memory_space<vmem>>, vector<8x128xf32>,
    %173 = vector.extract_strided_slice %12 {offsets = [48, 0], sizes = [8, 192], strides = [1, 1]} : vector<64x192xf32> to vector<8x192xf32>
    %174 = arith.truncf %169 : vector<8x64xf32> to vector<8x64xbf16>
    %cst_40 = arith.constant dense<0.000000e+00> : vector<8x192xf32>
    %175 = tpu.matmul %174, %14, %cst_40 {dimension_numbers = #tpu.dot_dimension_numbers<[1], [0], [0], [1], [0, 0, 1, 1], [], []>} : vector<8x64xbf16>, vector<64x192xbf16>, vector<8x192xf32> -> vector<8x192xf32>
    %176 = vector.extract_strided_slice %173 {offsets = [0, 0], sizes = [8, 128], strides = [1, 1]} : vector<8x192xf32> to vector<8x128xf32>
    %177 = vector.extract_strided_slice %175 {offsets = [0, 0], sizes = [8, 128], strides = [1, 1]} : vector<8x192xf32> to vector<8x128xf32>
    %178 = arith.addf %176, %177 : vector<8x128xf32>
    %179 = arith.negf %178 : vector<8x128xf32>
    %180 = math.exp %179 : vector<8x128xf32>
    %cst_41 = arith.constant 1.000000e+00 : f32
    %181 = vector.broadcast %cst_41 : f32 to vector<8x128xf32>
    %182 = arith.addf %181, %180 : vector<8x128xf32>
    %183 = arith.divf %181, %182 : vector<8x128xf32>
    %184 = vector.extract_strided_slice %183 {offsets = [0, 0], sizes = [8, 64], strides = [1, 1]} : vector<8x128xf32> to vector<8x64xf32>
    %185 = vector.extract_strided_slice %183 {offsets = [0, 64], sizes = [8, 64], strides = [1, 1]} : vector<8x128xf32> to vector<8x64xf32>
    %186 = vector.extract_strided_slice %173 {offsets = [0, 128], sizes = [8, 64], strides = [1, 1]} : vector<8x192xf32> to vector<8x64xf32>
    %187 = vector.extract_strided_slice %175 {offsets = [0, 128], sizes = [8, 64], strides = [1, 1]} : vector<8x192xf32> to vector<8x64xf32>
    %188 = arith.addf %187, %21 : vector<8x64xf32>
    %189 = arith.mulf %184, %188 : vector<8x64xf32>
    %190 = arith.addf %186, %189 : vector<8x64xf32>
    %191 = math.tanh %190 : vector<8x64xf32>
    %192 = arith.subf %169, %191 : vector<8x64xf32>
    %193 = arith.mulf %185, %192 : vector<8x64xf32>
    %194 = arith.addf %191, %193 : vector<8x64xf32>
    %cst_42 = arith.constant dense<0.000000e+00> : vector<8x128xf32>
    %195 = tpu.matmul %194, %15, %cst_42 {dimension_numbers = #tpu.dot_dimension_numbers<[1], [0], [0], [1], [0, 0, 1, 1], [], []>} : vector<8x64xf32>, vector<64x128xf32>, vector<8x128xf32> -> vector<8x128xf32>
    %196 = arith.addf %195, %18 : vector<8x128xf32>
    %c48 = arith.constant 48 : index
    %c0_43 = arith.constant 0 : index
    %197 = vector.load %arg4[%c48, %c0_43] : memref<64x128xf32, #tpu.memory_space<vmem>>, vector<8x128xf32>
    tpu.vector_store %arg4[%c48, %c0_43], %196 {strides = array<i32>} : memref<64x128xf32, #tpu.memory_space<vmem>>, vector<8x128xf32>,
    %198 = vector.extract_strided_slice %12 {offsets = [56, 0], sizes = [8, 192], strides = [1, 1]} : vector<64x192xf32> to vector<8x192xf32>
    %199 = arith.truncf %194 : vector<8x64xf32> to vector<8x64xbf16>
    %cst_44 = arith.constant dense<0.000000e+00> : vector<8x192xf32>
    %200 = tpu.matmul %199, %14, %cst_44 {dimension_numbers = #tpu.dot_dimension_numbers<[1], [0], [0], [1], [0, 0, 1, 1], [], []>} : vector<8x64xbf16>, vector<64x192xbf16>, vector<8x192xf32> -> vector<8x192xf32>
    %201 = vector.extract_strided_slice %198 {offsets = [0, 0], sizes = [8, 128], strides = [1, 1]} : vector<8x192xf32> to vector<8x128xf32>
    %202 = vector.extract_strided_slice %200 {offsets = [0, 0], sizes = [8, 128], strides = [1, 1]} : vector<8x192xf32> to vector<8x128xf32>
    %203 = arith.addf %201, %202 : vector<8x128xf32>
    %204 = arith.negf %203 : vector<8x128xf32>
    %205 = math.exp %204 : vector<8x128xf32>
    %cst_45 = arith.constant 1.000000e+00 : f32
    %206 = vector.broadcast %cst_45 : f32 to vector<8x128xf32>
    %207 = arith.addf %206, %205 : vector<8x128xf32>
    %208 = arith.divf %206, %207 : vector<8x128xf32>
    %209 = vector.extract_strided_slice %208 {offsets = [0, 0], sizes = [8, 64], strides = [1, 1]} : vector<8x128xf32> to vector<8x64xf32>
    %210 = vector.extract_strided_slice %208 {offsets = [0, 64], sizes = [8, 64], strides = [1, 1]} : vector<8x128xf32> to vector<8x64xf32>
    %211 = vector.extract_strided_slice %198 {offsets = [0, 128], sizes = [8, 64], strides = [1, 1]} : vector<8x192xf32> to vector<8x64xf32>
    %212 = vector.extract_strided_slice %200 {offsets = [0, 128], sizes = [8, 64], strides = [1, 1]} : vector<8x192xf32> to vector<8x64xf32>
    %213 = arith.addf %212, %21 : vector<8x64xf32>
    %214 = arith.mulf %209, %213 : vector<8x64xf32>
    %215 = arith.addf %211, %214 : vector<8x64xf32>
    %216 = math.tanh %215 : vector<8x64xf32>
    %217 = arith.subf %194, %216 : vector<8x64xf32>
    %218 = arith.mulf %210, %217 : vector<8x64xf32>
    %219 = arith.addf %216, %218 : vector<8x64xf32>
    %cst_46 = arith.constant dense<0.000000e+00> : vector<8x128xf32>
    %220 = tpu.matmul %219, %15, %cst_46 {dimension_numbers = #tpu.dot_dimension_numbers<[1], [0], [0], [1], [0, 0, 1, 1], [], []>} : vector<8x64xf32>, vector<64x128xf32>, vector<8x128xf32> -> vector<8x128xf32>
    %221 = arith.addf %220, %18 : vector<8x128xf32>
    %c56 = arith.constant 56 : index
    %c0_47 = arith.constant 0 : index
    %222 = vector.load %arg4[%c56, %c0_47] : memref<64x128xf32, #tpu.memory_space<vmem>>, vector<8x128xf32>
    tpu.vector_store %arg4[%c56, %c0_47], %221 {strides = array<i32>} : memref<64x128xf32, #tpu.memory_space<vmem>>, vector<8x128xf32>,
    return
  }
}

</mosaic_0001>

<bundles_post_ra>
// kernel: tpu_custom_call.1
= control target key start
LH: loop header
LB: loop body
LE: loop exit
PB: predicated region body
PF: predicated region fallthrough
CT: control target
= control target key end

     0   :  { %9 = vsyncpa [#allocation3], 0  ;;  %s1709_s0 = inlined_call_operand.vmem [shape: f32[64,5], index: 0, kind: input, shape index: {}]   ;;  %s1710_s1 = inlined_call_operand.hbm [shape: f32[8,64], index: 1, kind: input, shape index: {}]   ;;  %s1711_s2 = inlined_call_operand.hbm [shape: f32[90,192], index: 2, kind: input, shape index: {}]   ;;  %s1712_s3 = inlined_call_operand.vmem [shape: f32[72,128], index: 3, kind: input, shape index: {}]   ;;  %s1713_s4 = inlined_call_operand.hbm [shape: f32[64,128], index: 4, kind: output, shape index: {}]  }
   0x1   :  { %10 = vsyncpa [#allocation6], 0 }
   0x2   :  { %11 = vsyncpa [#allocation4], 0  ;;  %s19_s17 = sshll.u32 %s1710_s1, 4  ;;  %s1274_s18 = smov [#allocation2]   ;;  %s20_s17 = int_to_ptr.hbm [resolvable:$true] %s19_s17 }
   0x3   :  { %s21_s19 = sshll.u32 %s1274_s18, 4  ;;  %s29_s22 = sshll.u32 %s1711_s2, 4  ;;  %s22_s19 = int_to_ptr.vmem [resolvable:$true] %s21_s19  ;;  %s30_s22 = int_to_ptr.hbm [resolvable:$true] %s29_s22 }
   0x4   :  { %24 = dma.hbm_to_vmem [thread:$0]  %s20_s17, 128, %s22_s19, [#allocation3]  }
   0x5   :  { %s1275_s23 = smov [#allocation5]   ;;  %s1276_s25 = smov 256  }
   0x6   :  { %s31_s24 = sshll.u32 %s1275_s23, 4  ;;  %s1277_s26 = smov 16   ;;  %s32_s24 = int_to_ptr.vmem [resolvable:$true] %s31_s24 }
   0x7   :  { %37 = dma.hbm_to_vmem [thread:$0]  %s30_s22, 3072, %s32_s24, [#allocation6], %s1276_s25, %s1276_s25, %s1277_s26  }
   0x8   :  { %1268 = dma.done.wait [#allocation3], 128  }
   0x9   :  { %1269 = vsyncadd [#allocation3], 4294967168 }
   0xa   :  { %1270 = dma.done.wait [#allocation6], 3072  }
   0xb   :  { %1271 = vsyncadd [#allocation6], 4294964224  ;;  %vm85_vm0 = vcmask 1044480   ;;  %vm60_vm1 = vcmask 39936   ;;  %v57_v0 = vld [vmem:[%s1712_s3 + $0x42] sm:$0x1f] }
   0xc   :  { %v49_v1 = vld [vmem:[%s1709_s0] sm:$0xff]  ;;  %v279_v2 = vld [vmem:[#allocation5 + $0x90] sm:$0xff]  ;;  %1078 = vmatpush.msk.msra.mxu0 %vm85_vm0, %v57_v0  ;;  %v281_v3 = vld [vmem:[#allocation5 + $0xa0] sm:$0xff]  ;;  %vm178_vm2 = vcmask 1040384   ;;  %vm319_vm3 = vcmask 1046528   ;;  %vm346_vm4 = vcmask 523264  }
   0xd   :  { %v283_v4 = vld [vmem:[#allocation5 + $0xb0] sm:$0x3]  ;;  %1079 = vmatmul.msk.f32.vlgmr.msra.gmra.mxu0 %vm60_vm1, %v49_v1  ;;  %v291_v6 = vpack.c.bf16 %v281_v3, %v279_v2  ;;  %v277_v8 = vld [vmem:[#allocation5 + $0x80] sm:$0xff]  ;;  %v145_v16 = vld [vmem:[#allocation5 + $0x38] sm:$0x1]  ;;  %vm153_vm5 = vcmask 203776  }
   0xe   :  { %v275_v5 = vld [vmem:[#allocation5 + $0x70] sm:$0xff]  ;;  %v293_v7 = vpack.c.bf16 %v283_v4, %v283_v4  ;;  %v273_v10 = vld [vmem:[#allocation5 + $0x60] sm:$0xff]  ;;  %1096 = vmatpush.msk.msra.mxu2 %vm178_vm2, %v145_v16  ;;  %v1332_v26 = vld [vmem:[#allocation2] sm:$0xff]  ;;  %s1278_s7 = smov 64   ;;  %s1064_s15 = sshll.u32 %s1713_s4, 4  ;;  %s1065_s15 = int_to_ptr.hbm [resolvable:$true] %s1064_s15 }
   0xf   :  { %v271_v9 = vld [vmem:[#allocation5 + $0x50] sm:$0xff]  ;;  %v289_v11 = vpack.c.bf16 %v277_v8, %v275_v5  ;;  %v330_v12 = vrot.slane %v291_v6, 1  ;;  %v269_v19 = vld [vmem:[#allocation5 + $0x40] sm:$0xff]  ;;  %v308_v28 = vpack.c.bf16 %v1332_v26, %v1332_v26  ;;  %v143_v30 = vld [vmem:[#allocation5 + $0x28] sm:$0xff]  ;;  %s1280_s16 = smov 128   ;;  %s1281_s17 = smov 8  }
  0x10   :  { %v334_v13 = vrot.slane %v293_v7, 1  ;;  %v287_v14 = vpack.c.bf16 %v273_v10, %v271_v9  ;;  %v144_v15 = vld [vmem:[#allocation5 + $0x30] sm:$0x1]  ;;  %v267_v18 = vld [vmem:[#allocation5 + $0x30] sm:$0xfc]  ;;  %v142_v29 = vld [vmem:[#allocation5 + $0x20] sm:$0xff]  ;;  %239 = vmatpush.msra.mxu2 %v143_v30 }
  0x11   :  { %v326_v17 = vrot.slane %v289_v11, 1  ;;  %1087 = vmatpush.msk.msra.mxu1 %vm178_vm2, %v144_v15  ;;  %v285_v23 = vpack.c.bf16 %v269_v19, %v267_v18  ;;  %v280_v31 = vld [vmem:[#allocation5 + $0x98] sm:$0xff]  ;;  %v282_v32 = vld [vmem:[#allocation5 + $0xa8] sm:$0xff]  ;;  %v140_v34 = vld [vmem:[#allocation5 + $0x10] sm:$0xff] }
  0x12   :  { %v1321_v20 = vsel %vm319_vm3, %v330_v12, %v334_v13  ;;  %v321_v22 = vrot.slane %v287_v14, 1  ;;  %v284_v33 = vld [vmem:[#allocation5 + $0xb8] sm:$0x3]  ;;  %v292_v36 = vpack.c.bf16 %v282_v32, %v280_v31  ;;  %v138_v38 = vld [vmem:[#allocation5] sm:$0xff]  ;;  %v139_v39 = vld [vmem:[#allocation5 + $0x8] sm:$0xff] }
  0x13   :  { %354 = vmatpush.bf16.msra.mxu3 %v1321_v20  ;;  %v1325_v21 = vsel %vm319_vm3, %v326_v17, %v330_v12  ;;  %v320_v25 = vrot.slane %v285_v23, 1  ;;  %198 = vmatpush.msra.mxu1 %v142_v29  ;;  %v141_v35 = vld [vmem:[#allocation5 + $0x18] sm:$0xff]  ;;  %v294_v37 = vpack.c.bf16 %v284_v33, %v284_v33  ;;  %v278_v43 = vld [vmem:[#allocation5 + $0x88] sm:$0xff] }
  0x14   :  { %v1329_v24 = vsel %vm319_vm3, %v321_v22, %v326_v17  ;;  %240 = vmatpush.msra.mxu2 %v141_v35  ;;  %v332_v40 = vrot.slane %v292_v36, 1  ;;  %v276_v42 = vld [vmem:[#allocation5 + $0x78] sm:$0xff]  ;;  %v274_v47 = vld [vmem:[#allocation5 + $0x68] sm:$0xff]  ;;  %v1402_v35 = vld [vmem:[%s1712_s3 + $0x38] sm:$0xff] }
  0x15   :  { %v1335_v27 = vsel %vm319_vm3, %v320_v25, %v321_v22  ;;  %199 = vmatpush.msra.mxu1 %v140_v34  ;;  %v336_v41 = vrot.slane %v294_v37, 1  ;;  %v290_v45 = vpack.c.bf16 %v278_v43, %v276_v42  ;;  %v272_v46 = vld [vmem:[#allocation5 + $0x58] sm:$0xff]  ;;  %v270_v50 = vld [vmem:[#allocation5 + $0x48] sm:$0xff]  ;;  %v50_v34 = vld [vmem:[%s1709_s0 + $0x8] sm:$0xff] }
  0x16   :  { %241 = vmatpush.msra.mxu2 %v139_v39  ;;  %v268_v48 = vld [vmem:[#allocation5 + $0x38] sm:$0xfc]  ;;  %v288_v49 = vpack.c.bf16 %v274_v47, %v272_v46  ;;  %v147_v1 = vld [vmem:[#allocation5 + $0x31] ss:$8 sm:$0x3]  ;;  %1080 = vmatmul.msk.f32.gmra.mxu0 %vm60_vm1, %v50_v34  ;;  %v1407_v36 = vld [vmem:[%s1712_s3 + $0x30] sm:$0xff] }
  0x17   :  { %355 = vmatpush.bf16.msra.mxu3 %v1325_v21  ;;  %200 = vmatpush.msra.mxu1 %v138_v38  ;;  %v1342_v44 = vsel %vm319_vm3, %v332_v40, %v336_v41  ;;  %v328_v51 = vrot.slane %v290_v45, 1  ;;  %v286_v52 = vpack.c.bf16 %v270_v50, %v268_v48  ;;  %v1369_v58 = vld [vmem:[%s1712_s3 + $0x47] ss:$0 sm:$0xff]  ;;  %v1378_v2 = vperm.slane %v147_v1, 0  ;;  %v1384_v12 = vld [vmem:[%s1712_s3 + $0x41] ss:$0 sm:$0xff] }
  0x18   :  { %532 = vmatpush.bf16.msrb.mxu2 %v1321_v20  ;;  %456 = vmatpush.bf16.msrb.mxu0 %v1342_v44  ;;  %v324_v53 = vrot.slane %v288_v49, 1  ;;  %v1386_v17 = vperm.slane %v147_v1, 1  ;;  %v51_v37 = vld [vmem:[%s1709_s0 + $0x10] sm:$0xff]  ;;  %v1425_v38 = vld [vmem:[%s1712_s3 + $0x20] sm:$0xff]  ;;  %v1434_v39 = vld [vmem:[%s1712_s3 + $0x18] sm:$0xff] }
  0x19   :  { %v1348_v54 = vsel %vm319_vm3, %v328_v51, %v332_v40  ;;  %v323_v56 = vrot.slane %v286_v52, 1  ;;  %511 = vmatpush.msrb.mxu1 %v1402_v35  ;;  %v1441_v40 = vld [vmem:[%s1712_s3 + $0x10] sm:$0xff]  ;;  %v1449_v41 = vld [vmem:[%s1712_s3 + $0x8] sm:$0xff]  ;;  %v52_v42 = vld [vmem:[%s1709_s0 + $0x18] sm:$0xff] }
  0x1a   :  { %v1354_v55 = vsel %vm319_vm3, %v324_v53, %v328_v51  ;;  %v1460_v43 = vld [vmem:[%s1712_s3] sm:$0xff]  ;;  %v54_v46 = vld [vmem:[%s1709_s0 + $0x28] sm:$0xff]  ;;  %v55_v49 = vld [vmem:[%s1709_s0 + $0x30] sm:$0xff] }
  0x1b   :  { %356 = vmatpush.bf16.msra.mxu3 %v1329_v24  ;;  %v1360_v57 = vsel %vm319_vm3, %v323_v56, %v324_v53  ;;  %512 = vmatpush.msrb.mxu1 %v1407_v36  ;;  %v53_v45 = vld [vmem:[%s1709_s0 + $0x20] sm:$0xff]  ;;  %v56_v50 = vld [vmem:[%s1709_s0 + $0x38] sm:$0xff] }
  0x1c   :  { %533 = vmatpush.bf16.msrb.mxu2 %v1325_v21  ;;  %457 = vmatpush.bf16.msrb.mxu0 %v1348_v54 }
  0x1e   :  { %1081 = vmatmul.msk.f32.gmra.mxu0 %vm60_vm1, %v51_v37 }
  0x1f   :  { %357 = vmatpush.bf16.msra.mxu3 %v1335_v27 }
  0x20   :  { %534 = vmatpush.bf16.msrb.mxu2 %v1329_v24  ;;  %458 = vmatpush.bf16.msrb.mxu0 %v1354_v55 }
  0x22   :  { %1105 = vmatmul.msk.bf16.vlgmr.msra.gmra.mxu3 %vm346_vm4, %v308_v28 }
  0x23   :  { %367 = vmatpush.bf16.msrb.mxu3 %v1342_v44 }
  0x24   :  { %535 = vmatpush.bf16.msrb.mxu2 %v1335_v27  ;;  %459 = vmatpush.bf16.msrb.mxu0 %v1360_v57 }
  0x26   :  { %1082 = vmatmul.msk.f32.gmra.mxu0 %vm60_vm1, %v52_v42 }
  0x27   :  { %368 = vmatpush.bf16.msrb.mxu3 %v1348_v54 }
  0x28   :  { %600 = vmatpush.msra.mxu0 %v1402_v35 }
  0x2a   :  { %601 = vmatpush.msra.mxu0 %v1407_v36 }
  0x2b   :  { %369 = vmatpush.bf16.msrb.mxu3 %v1354_v55 }
  0x2e   :  { %1083 = vmatmul.msk.f32.gmra.mxu0 %vm60_vm1, %v53_v45 }
  0x2f   :  { %370 = vmatpush.bf16.msrb.mxu3 %v1360_v57 }
  0x32   :  { %1106 = vmatmul.msk.bf16.vlgmr.msrb.gmra.mxu3 %vm346_vm4, %v308_v28 }
  0x33   :  { %422 = vmatpush.msra.mxu3 %v1402_v35 }
  0x35   :  { %423 = vmatpush.msra.mxu3 %v1407_v36 }
  0x36   :  { %1084 = vmatmul.msk.f32.gmra.mxu0 %vm60_vm1, %v54_v46 }
  0x3e   :  { %1085 = vmatmul.msk.f32.gmra.mxu0 %vm60_vm1, %v55_v49 }
  0x46   :  { %1086 = vmatmul.msk.f32.gmra.mxu0 %vm60_vm1, %v56_v50 }
  0x8a   :  { %v106_v59 = vpop.f32.mrf.mxu0 }
  0x8b   :  { %v107_v60 = vadd.f32 %v1369_v58, %v106_v59 }
  0x8d   :  { %v130_v61 = vmax.f32 %v107_v60, 0.0 }
  0x8f   :  { %1088 = vmatmul.msk.f32.vlgmr.msra.gmra.mxu1 %vm153_vm5, %v130_v61  ;;  %1097 = vmatmul.msk.f32.vlgmr.msra.gmra.mxu2 %vm153_vm5, %v130_v61 }
  0x90   :  { %634 = vmatpush.bf16.msra.mxu2 %v1342_v44 }
  0x93   :  { %v109_v51 = vpop.f32.mrf.mxu0 }
  0x94   :  { %635 = vmatpush.bf16.msra.mxu2 %v1348_v54  ;;  %v110_v52 = vadd.f32 %v1369_v58, %v109_v51 }
  0x96   :  { %v131_v53 = vmax.f32 %v110_v52, 0.0 }
  0x98   :  { %636 = vmatpush.bf16.msra.mxu2 %v1354_v55  ;;  %1089 = vmatmul.msk.f32.gmra.mxu1 %vm153_vm5, %v131_v53 }
  0x99   :  { %1098 = vmatmul.msk.f32.gmra.mxu2 %vm153_vm5, %v131_v53 }
  0x9b   :  { %v112_v56 = vpop.f32.mrf.mxu0 }
  0x9c   :  { %637 = vmatpush.bf16.msra.mxu2 %v1360_v57  ;;  %v113_v59 = vadd.f32 %v1369_v58, %v112_v56 }
  0x9e   :  { %v132_v60 = vmax.f32 %v113_v59, 0.0 }
  0xa0   :  { %1090 = vmatmul.msk.f32.gmra.mxu1 %vm153_vm5, %v132_v60 }
  0xa1   :  { %1099 = vmatmul.msk.f32.gmra.mxu2 %vm153_vm5, %v132_v60 }
  0xa3   :  { %v115_v61 = vpop.f32.mrf.mxu0 }
  0xa5   :  { %v359_v62 = vpop.f32.mrf.mxu3 }
  0xad   :  { %v361_v63 = vpop.f32.mrf.mxu3 }
  0xb5   :  { %v372_v0 = vpop.f32.mrf.mxu3 }
  0xb6   :  { %v396_v19 = vadd.f32 %v1384_v12, %v372_v0 }
  0xbd   :  { %v374_v3 = vpop.f32.mrf.mxu3 }
  0xbe   :  { %v118_v3 = vpop.f32.mrf.mxu0 }
 0x10c   :  { %v202_v4 = vpop.f32.mrf.mxu1 }
 0x10d   :  { %v203_v5 = vadd.f32 %v202_v4, %v1378_v2 }
 0x10f   :  { %v376_v6 = vadd.f32 %v359_v62, %v203_v5  ;;  %v116_v62 = vadd.f32 %v1369_v58, %v115_v61  ;;  %v119_v5 = vadd.f32 %v1369_v58, %v118_v3 }
 0x111   :  { %v1107_v7 = vmul.f32 -1.442695, %v376_v6  ;;  %v133_v63 = vmax.f32 %v116_v62, 0.0  ;;  %v134_v6 = vmax.f32 %v119_v5, 0.0 }
 0x112   :  { %v243_v22 = vpop.f32.mrf.mxu2 }
 0x113   :  { %1148 = vpow2.f32 %v1107_v7  ;;  %v244_v29 = vadd.f32 %v243_v22, %v1386_v17  ;;  %1091 = vmatmul.msk.f32.gmra.mxu1 %vm153_vm5, %v133_v63  ;;  %1100 = vmatmul.msk.f32.gmra.mxu2 %vm153_vm5, %v133_v63  ;;  %v121_v7 = vpop.f32.mrf.mxu0 }
 0x119   :  { %v1149_v8 = vpop.eup %1148 }
 0x11a   :  { %v380_v9 = vadd.f32 1.0, %v1149_v8  ;;  %v122_v8 = vadd.f32 %v1369_v58, %v121_v7 }
 0x11b   :  { %1092 = vmatmul.msk.f32.gmra.mxu1 %vm153_vm5, %v134_v6  ;;  %1101 = vmatmul.msk.f32.gmra.mxu2 %vm153_vm5, %v134_v6 }
 0x11c   :  { %1150 = vrcp.f32 %v380_v9  ;;  %v392_v14 = vand.u32 2147483648, %v380_v9  ;;  %v390_v16 = vand.u32 2147483647, %v380_v9  ;;  %vm386_vm7 = vweird.f32 %v380_v9  ;;  %v246_v50 = vpop.f32.mrf.mxu2 }
 0x11d   :  { %v247_v59 = vadd.f32 %v246_v50, %v1386_v17 }
 0x11e   :  { %v393_v23 = vor.u32 1.1754944e-38, %v392_v14  ;;  %vm391_vm9 = vcmp.eq.f32.partialorder %v390_v16, 8.507059e+37 }
 0x122   :  { %v1151_v10 = vpop.eup %1150 }
 0x123   :  { %v382_v11 = vmul.f32 %v1151_v10, %v380_v9  ;;  %vm387_vm6 = vweird.f32 %v1151_v10  ;;  %v135_v9 = vmax.f32 %v122_v8, 0.0 }
 0x124   :  { %vm388_vm8 = vmor %vm386_vm7, %vm387_vm6  ;;  %v249_v7 = vpop.f32.mrf.mxu2 }
 0x125   :  { %v383_v13 = vsub.f32 1.0, %v382_v11  ;;  %1093 = vmatmul.msk.f32.gmra.mxu1 %vm153_vm5, %v135_v9  ;;  %1102 = vmatmul.msk.f32.gmra.mxu2 %vm153_vm5, %v135_v9 }
 0x127   :  { %v384_v15 = vmul.f32 %v1151_v10, %v383_v13 }
 0x129   :  { %v385_v18 = vadd.f32 %v1151_v10, %v384_v15 }
 0x12b   :  { %v389_v25 = vsel %vm388_vm8, %v1151_v10, %v385_v18  ;;  %v124_v10 = vpop.f32.mrf.mxu0 }
 0x12c   :  { %v394_v28 = vsel %vm391_vm9, %v393_v23, %v389_v25  ;;  %v125_v11 = vadd.f32 %v1369_v58, %v124_v10  ;;  %v205_v23 = vpop.f32.mrf.mxu1 }
 0x12d   :  { %v397_v30 = vmul.f32 %v396_v19, %v394_v28  ;;  %v1545_v19 = vld [vmem:[%s1712_s3 + $0x40] ss:$0 sm:$0xff] }
 0x12e   :  { %v136_v13 = vmax.f32 %v125_v11, 0.0 }
 0x12f   :  { %v398_v31 = vadd.f32 %v397_v30, %v244_v29 }
 0x130   :  { %1094 = vmatmul.msk.f32.gmra.mxu1 %vm153_vm5, %v136_v13  ;;  %1103 = vmatmul.msk.f32.gmra.mxu2 %vm153_vm5, %v136_v13 }
 0x131   :  { %1152 = vtanh.f32 %v398_v31 }
 0x133   :  { %v127_v14 = vpop.f32.mrf.mxu0 }
 0x134   :  { %v128_v15 = vadd.f32 %v1369_v58, %v127_v14 }
 0x136   :  { %v137_v16 = vmax.f32 %v128_v15, 0.0 }
 0x137   :  { %v1390_v32 = vpop.eup %1152 }
 0x138   :  { %v400_v33 = vsub.f32 %v1332_v26, %v1390_v32  ;;  %v1414_v26 = vld [vmem:[%s1712_s3 + $0x28] sm:$0xff]  ;;  %1095 = vmatmul.msk.f32.gmra.mxu1 %vm153_vm5, %v137_v16  ;;  %1104 = vmatmul.msk.f32.gmra.mxu2 %vm153_vm5, %v137_v16  ;;  %s1279_s3 = smov [#allocation7]  }
 0x139   :  { %424 = vmatpush.msra.mxu3 %v1414_v26  ;;  %513 = vmatpush.msrb.mxu1 %v1414_v26  ;;  %s1062_s12 = sshll.u32 %s1279_s3, 4  ;;  %s1063_s12 = int_to_ptr.vmem [resolvable:$true] %s1062_s12 }
 0x13a   :  { %402 = vrot.lane.b32.xlu0 %v400_v33, %s1278_s7  ;;  %602 = vmatpush.msra.mxu0 %v1414_v26 }
 0x13b   :  { %425 = vmatpush.msra.mxu3 %v1425_v38  ;;  %514 = vmatpush.msrb.mxu1 %v1425_v38 }
 0x13c   :  { %603 = vmatpush.msra.mxu0 %v1425_v38 }
 0x13d   :  { %426 = vmatpush.msra.mxu3 %v1434_v39  ;;  %515 = vmatpush.msrb.mxu1 %v1434_v39 }
 0x13e   :  { %604 = vmatpush.msra.mxu0 %v1434_v39 }
 0x13f   :  { %427 = vmatpush.msra.mxu3 %v1441_v40  ;;  %516 = vmatpush.msrb.mxu1 %v1441_v40 }
 0x140   :  { %605 = vmatpush.msra.mxu0 %v1441_v40 }
 0x141   :  { %428 = vmatpush.msra.mxu3 %v1449_v41  ;;  %517 = vmatpush.msrb.mxu1 %v1449_v41 }
 0x142   :  { %606 = vmatpush.msra.mxu0 %v1449_v41 }
 0x143   :  { %429 = vmatpush.msra.mxu3 %v1460_v43  ;;  %518 = vmatpush.msrb.mxu1 %v1460_v43 }
 0x144   :  { %607 = vmatpush.msra.mxu0 %v1460_v43 }
 0x145   :  { %443 = vmatpush.bf16.msrb.mxu3 %v1321_v20  ;;  %621 = vmatpush.bf16.msra.mxu1 %v1321_v20 }
 0x149   :  { %444 = vmatpush.bf16.msrb.mxu3 %v1325_v21  ;;  %622 = vmatpush.bf16.msra.mxu1 %v1325_v21 }
 0x14d   :  { %445 = vmatpush.bf16.msrb.mxu3 %v1329_v24  ;;  %623 = vmatpush.bf16.msra.mxu1 %v1329_v24 }
 0x151   :  { %446 = vmatpush.bf16.msrb.mxu3 %v1335_v27  ;;  %624 = vmatpush.bf16.msra.mxu1 %v1335_v27 }
 0x196   :  { %v1580_v9 = vpop.f32.mrf.mxu2 }
 0x19e   :  { %v1584_v11 = vpop.f32.mrf.mxu2 }
 0x1a8   :  { %v1588_v14 = vpop.f32.mrf.mxu2 }
 0x1ac   :  { %v403_v47 = vpop.permute.xlu0 %402 }
 0x1ad   :  { %v405_v48 = vmul.f32 %v403_v47, %v394_v28  ;;  %v206_v28 = vadd.f32 %v205_v23, %v1378_v2 }
 0x1af   :  { %407 = vrot.lane.b32.xlu0 %v405_v48, %s1278_s7 }
 0x1b3   :  { %v1592_v16 = vpop.f32.mrf.mxu2 }
 0x221   :  { %v408_v0 = vpop.permute.xlu0 %407 }
 0x222   :  { %v1506_v1 = vadd.f32 %v1390_v32, %v408_v0 }
 0x224   :  { %v435_v4 = vpack.c.bf16 %v1506_v1, %v1506_v1  ;;  %1108 = vmatmul.msk.f32.vlgmr.msra.gmra.mxu3 %vm346_vm4, %v1506_v1 }
 0x225   :  { %545 = vmatpush.bf16.msra.mxu3 %v1342_v44 }
 0x226   :  { %1110 = vmatmul.msk.bf16.vlgmr.msrb.gmra.mxu0 %vm346_vm4, %v435_v4 }
 0x227   :  { %710 = vmatpush.bf16.msrb.mxu0 %v1321_v20 }
 0x229   :  { %546 = vmatpush.bf16.msra.mxu3 %v1348_v54 }
 0x22b   :  { %711 = vmatpush.bf16.msrb.mxu0 %v1325_v21 }
 0x22c   :  { %1109 = vmatmul.msk.bf16.vlgmr.msrb.gmra.mxu3 %vm346_vm4, %v435_v4 }
 0x22d   :  { %547 = vmatpush.bf16.msra.mxu3 %v1354_v55 }
 0x22f   :  { %712 = vmatpush.bf16.msrb.mxu0 %v1329_v24 }
 0x231   :  { %548 = vmatpush.bf16.msra.mxu3 %v1360_v57 }
 0x233   :  { %713 = vmatpush.bf16.msrb.mxu0 %v1335_v27 }
 0x235   :  { %689 = vmatpush.msrb.mxu3 %v1402_v35 }
 0x237   :  { %690 = vmatpush.msrb.mxu3 %v1407_v36 }
 0x239   :  { %691 = vmatpush.msrb.mxu3 %v1414_v26 }
 0x23b   :  { %692 = vmatpush.msrb.mxu3 %v1425_v38 }
 0x23d   :  { %693 = vmatpush.msrb.mxu3 %v1434_v39 }
 0x23f   :  { %694 = vmatpush.msrb.mxu3 %v1441_v40 }
 0x241   :  { %695 = vmatpush.msrb.mxu3 %v1449_v41 }
 0x243   :  { %696 = vmatpush.msrb.mxu3 %v1460_v43 }
 0x2a3   :  { %v461_v18 = vpop.f32.mrf.mxu0 }
 0x2a4   :  { %v485_v52 = vadd.f32 %v1384_v12, %v461_v18 }
 0x2a7   :  { %v431_v22 = vpop.f32.mrf.mxu3 }
 0x2a8   :  { %v432_v58 = vadd.f32 %v1545_v19, %v431_v22  ;;  %v1596_v22 = vpop.f32.mrf.mxu2 }
 0x2aa   :  { %434 = vst [vmem:[#allocation7] sm:$0xff] %v432_v58 }
 0x2ab   :  { %v463_v25 = vpop.f32.mrf.mxu0 }
 0x2af   :  { %v448_v29 = vpop.f32.mrf.mxu3 }
 0x2b0   :  { %v465_v30 = vadd.f32 %v448_v29, %v206_v28 }
 0x2b2   :  { %v1111_v31 = vmul.f32 -1.442695, %v465_v30 }
 0x2b4   :  { %1154 = vpow2.f32 %v1111_v31 }
 0x2b7   :  { %v450_v32 = vpop.f32.mrf.mxu3 }
 0x2ba   :  { %v1155_v33 = vpop.eup %1154 }
 0x2bb   :  { %v469_v34 = vadd.f32 1.0, %v1155_v33 }
 0x2bd   :  { %1156 = vrcp.f32 %v469_v34  ;;  %v481_v46 = vand.u32 2147483648, %v469_v34  ;;  %v479_v48 = vand.u32 2147483647, %v469_v34  ;;  %vm475_vm11 = vweird.f32 %v469_v34 }
 0x2bf   :  { %v482_v51 = vor.u32 1.1754944e-38, %v481_v46  ;;  %vm480_vm13 = vcmp.eq.f32.partialorder %v479_v48, 8.507059e+37 }
 0x2c3   :  { %v1157_v37 = vpop.eup %1156 }
 0x2c4   :  { %v471_v42 = vmul.f32 %v1157_v37, %v469_v34  ;;  %vm476_vm10 = vweird.f32 %v1157_v37 }
 0x2c5   :  { %vm477_vm12 = vmor %vm475_vm11, %vm476_vm10 }
 0x2c6   :  { %v472_v45 = vsub.f32 1.0, %v471_v42 }
 0x2c8   :  { %v473_v47 = vmul.f32 %v1157_v37, %v472_v45 }
 0x2ca   :  { %v474_v49 = vadd.f32 %v1157_v37, %v473_v47 }
 0x2cc   :  { %v478_v53 = vsel %vm477_vm12, %v1157_v37, %v474_v49 }
 0x2cd   :  { %v483_v56 = vsel %vm480_vm13, %v482_v51, %v478_v53 }
 0x2ce   :  { %v486_v60 = vmul.f32 %v485_v52, %v483_v56 }
 0x2d0   :  { %v487_v61 = vadd.f32 %v486_v60, %v247_v59  ;;  %v250_v59 = vadd.f32 %v249_v7, %v1386_v17 }
 0x2d2   :  { %1158 = vtanh.f32 %v487_v61 }
 0x2d8   :  { %v1159_v62 = vpop.eup %1158 }
 0x2d9   :  { %v489_v63 = vsub.f32 %v1506_v1, %v1159_v62  ;;  %v208_v1 = vpop.f32.mrf.mxu1 }
 0x2da   :  { %v209_v25 = vadd.f32 %v208_v1, %v1378_v2 }
 0x2db   :  { %491 = vrot.lane.b32.xlu1 %v489_v63, %s1278_s7 }
 0x2e1   :  { %v1578_v8 = vpop.f32.mrf.mxu1 }
 0x2e2   :  { %v212_v7 = vadd.f32 %v1578_v8, %v1378_v2 }
 0x2e9   :  { %v1582_v10 = vpop.f32.mrf.mxu1 }
 0x2f1   :  { %v1586_v13 = vpop.f32.mrf.mxu1 }
 0x2f9   :  { %v1590_v15 = vpop.f32.mrf.mxu1 }
 0x301   :  { %v1594_v18 = vpop.f32.mrf.mxu1 }
 0x34d   :  { %v492_v0 = vpop.permute.xlu1 %491 }
 0x34e   :  { %v494_v3 = vmul.f32 %v492_v0, %v483_v56 }
 0x350   :  { %496 = vrot.lane.b32.xlu1 %v494_v3, %s1278_s7 }
 0x3c2   :  { %v497_v4 = vpop.permute.xlu1 %496 }
 0x3c3   :  { %v1554_v5 = vadd.f32 %v1159_v62, %v497_v4 }
 0x3c5   :  { %v524_v6 = vpack.c.bf16 %v1554_v5, %v1554_v5  ;;  %1112 = vmatmul.msk.f32.vlgmr.msrb.gmra.mxu1 %vm346_vm4, %v1554_v5 }
 0x3c6   :  { %723 = vmatpush.bf16.msrb.mxu1 %v1342_v44 }
 0x3c7   :  { %1113 = vmatmul.msk.bf16.vlgmr.msrb.gmra.mxu2 %vm346_vm4, %v524_v6  ;;  %1114 = vmatmul.msk.bf16.vlgmr.msra.gmra.mxu3 %vm346_vm4, %v524_v6 }
 0x3c8   :  { %778 = vmatpush.msrb.mxu2 %v1402_v35  ;;  %799 = vmatpush.bf16.msra.mxu3 %v1321_v20 }
 0x3ca   :  { %724 = vmatpush.bf16.msrb.mxu1 %v1348_v54  ;;  %779 = vmatpush.msrb.mxu2 %v1407_v36 }
 0x3cc   :  { %780 = vmatpush.msrb.mxu2 %v1414_v26  ;;  %800 = vmatpush.bf16.msra.mxu3 %v1325_v21 }
 0x3ce   :  { %725 = vmatpush.bf16.msrb.mxu1 %v1354_v55  ;;  %781 = vmatpush.msrb.mxu2 %v1425_v38 }
 0x3d0   :  { %782 = vmatpush.msrb.mxu2 %v1434_v39  ;;  %801 = vmatpush.bf16.msra.mxu3 %v1329_v24 }
 0x3d2   :  { %726 = vmatpush.bf16.msrb.mxu1 %v1360_v57  ;;  %783 = vmatpush.msrb.mxu2 %v1441_v40 }
 0x3d4   :  { %784 = vmatpush.msrb.mxu2 %v1449_v41  ;;  %802 = vmatpush.bf16.msra.mxu3 %v1335_v27 }
 0x3d6   :  { %785 = vmatpush.msrb.mxu2 %v1460_v43 }
 0x442   :  { %v520_v58 = vpop.f32.mrf.mxu1 }
 0x443   :  { %v521_v23 = vadd.f32 %v1545_v19, %v520_v58 }
 0x445   :  { %523 = vst [vmem:[#allocation7 + $0x8] sm:$0xff] %v521_v23 }
 0x44a   :  { %v537_v28 = vpop.f32.mrf.mxu2  ;;  %v550_v29 = vpop.f32.mrf.mxu3 }
 0x44b   :  { %v554_v30 = vadd.f32 %v537_v28, %v209_v25  ;;  %v574_v53 = vadd.f32 %v1384_v12, %v550_v29 }
 0x44d   :  { %v1115_v31 = vmul.f32 -1.442695, %v554_v30 }
 0x44f   :  { %1160 = vpow2.f32 %v1115_v31 }
 0x452   :  { %v539_v32 = vpop.f32.mrf.mxu2  ;;  %v552_v33 = vpop.f32.mrf.mxu3 }
 0x455   :  { %v1161_v34 = vpop.eup %1160 }
 0x456   :  { %v558_v37 = vadd.f32 1.0, %v1161_v34 }
 0x458   :  { %1162 = vrcp.f32 %v558_v37  ;;  %v570_v47 = vand.u32 2147483648, %v558_v37  ;;  %v568_v49 = vand.u32 2147483647, %v558_v37  ;;  %vm564_vm15 = vweird.f32 %v558_v37 }
 0x45a   :  { %v571_v51 = vor.u32 1.1754944e-38, %v570_v47  ;;  %vm569_vm1 = vcmp.eq.f32.partialorder %v568_v49, 8.507059e+37 }
 0x45e   :  { %v1163_v42 = vpop.eup %1162 }
 0x45f   :  { %v560_v45 = vmul.f32 %v1163_v42, %v558_v37  ;;  %vm565_vm14 = vweird.f32 %v1163_v42 }
 0x460   :  { %vm566_vm0 = vmor %vm564_vm15, %vm565_vm14 }
 0x461   :  { %v561_v46 = vsub.f32 1.0, %v560_v45 }
 0x463   :  { %v562_v48 = vmul.f32 %v1163_v42, %v561_v46 }
 0x465   :  { %v563_v50 = vadd.f32 %v1163_v42, %v562_v48 }
 0x467   :  { %v567_v52 = vsel %vm566_vm0, %v1163_v42, %v563_v50 }
 0x468   :  { %v572_v56 = vsel %vm569_vm1, %v571_v51, %v567_v52  ;;  %v253_v52 = vadd.f32 %v1580_v9, %v1386_v17 }
 0x469   :  { %v575_v60 = vmul.f32 %v574_v53, %v572_v56 }
 0x46b   :  { %v576_v61 = vadd.f32 %v575_v60, %v250_v59 }
 0x46d   :  { %1164 = vtanh.f32 %v576_v61 }
 0x473   :  { %v1165_v62 = vpop.eup %1164 }
 0x474   :  { %v578_v63 = vsub.f32 %v1554_v5, %v1165_v62 }
 0x476   :  { %580 = vrot.lane.b32.xlu2 %v578_v63, %s1278_s7 }
 0x4d0   :  { %v581_v0 = vpop.permute.xlu2 %580 }
 0x4d1   :  { %v583_v3 = vmul.f32 %v581_v0, %v572_v56 }
 0x4d3   :  { %585 = vrot.lane.b32.xlu2 %v583_v3, %s1278_s7 }
 0x52d   :  { %v586_v4 = vpop.permute.xlu2 %585 }
 0x52e   :  { %v588_v6 = vadd.f32 %v1165_v62, %v586_v4 }
 0x530   :  { %v613_v1 = vpack.c.bf16 %v588_v6, %v588_v6  ;;  %1116 = vmatmul.msk.f32.vlgmr.msra.gmra.mxu0 %vm346_vm4, %v588_v6 }
 0x531   :  { %812 = vmatpush.bf16.msra.mxu0 %v1342_v44 }
 0x532   :  { %1117 = vmatmul.msk.bf16.vlgmr.msra.gmra.mxu1 %vm346_vm4, %v613_v1  ;;  %1118 = vmatmul.msk.bf16.vlgmr.msra.gmra.mxu2 %vm346_vm4, %v613_v1 }
 0x533   :  { %867 = vmatpush.msra.mxu1 %v1402_v35  ;;  %888 = vmatpush.bf16.msra.mxu2 %v1321_v20 }
 0x535   :  { %813 = vmatpush.bf16.msra.mxu0 %v1348_v54  ;;  %868 = vmatpush.msra.mxu1 %v1407_v36 }
 0x537   :  { %869 = vmatpush.msra.mxu1 %v1414_v26  ;;  %889 = vmatpush.bf16.msra.mxu2 %v1325_v21 }
 0x539   :  { %814 = vmatpush.bf16.msra.mxu0 %v1354_v55  ;;  %870 = vmatpush.msra.mxu1 %v1425_v38 }
 0x53b   :  { %871 = vmatpush.msra.mxu1 %v1434_v39  ;;  %890 = vmatpush.bf16.msra.mxu2 %v1329_v24 }
 0x53d   :  { %815 = vmatpush.bf16.msra.mxu0 %v1360_v57  ;;  %872 = vmatpush.msra.mxu1 %v1441_v40 }
 0x53f   :  { %873 = vmatpush.msra.mxu1 %v1449_v41  ;;  %891 = vmatpush.bf16.msra.mxu2 %v1335_v27 }
 0x541   :  { %874 = vmatpush.msra.mxu1 %v1460_v43 }
 0x5ad   :  { %v609_v5 = vpop.f32.mrf.mxu0 }
 0x5ae   :  { %v610_v58 = vadd.f32 %v1545_v19, %v609_v5 }
 0x5af   :  { %v626_v23 = vpop.f32.mrf.mxu1 }
 0x5b0   :  { %612 = vst [vmem:[#allocation7 + $0x10] sm:$0xff] %v610_v58  ;;  %v643_v25 = vadd.f32 %v626_v23, %v212_v7 }
 0x5b2   :  { %v1119_v28 = vmul.f32 -1.442695, %v643_v25 }
 0x5b4   :  { %1166 = vpow2.f32 %v1119_v28 }
 0x5b5   :  { %v639_v29 = vpop.f32.mrf.mxu2 }
 0x5b6   :  { %v663_v50 = vadd.f32 %v1384_v12, %v639_v29 }
 0x5b7   :  { %v628_v30 = vpop.f32.mrf.mxu1 }
 0x5ba   :  { %v1167_v31 = vpop.eup %1166 }
 0x5bb   :  { %v647_v32 = vadd.f32 1.0, %v1167_v31 }
 0x5bd   :  { %1168 = vrcp.f32 %v647_v32  ;;  %v641_v33 = vpop.f32.mrf.mxu2  ;;  %v659_v45 = vand.u32 2147483648, %v647_v32  ;;  %v657_v8 = vand.u32 2147483647, %v647_v32  ;;  %vm653_vm3 = vweird.f32 %v647_v32 }
 0x5bf   :  { %v660_v48 = vor.u32 1.1754944e-38, %v659_v45  ;;  %vm658_vm6 = vcmp.eq.f32.partialorder %v657_v8, 8.507059e+37 }
 0x5c3   :  { %v1169_v34 = vpop.eup %1168 }
 0x5c4   :  { %v649_v37 = vmul.f32 %v1169_v34, %v647_v32  ;;  %vm654_vm2 = vweird.f32 %v1169_v34 }
 0x5c5   :  { %vm655_vm5 = vmor %vm653_vm3, %vm654_vm2 }
 0x5c6   :  { %v650_v42 = vsub.f32 1.0, %v649_v37 }
 0x5c8   :  { %v651_v46 = vmul.f32 %v1169_v34, %v650_v42  ;;  %v256_v42 = vadd.f32 %v1584_v11, %v1386_v17 }
 0x5ca   :  { %v652_v47 = vadd.f32 %v1169_v34, %v651_v46 }
 0x5cc   :  { %v656_v49 = vsel %vm655_vm5, %v1169_v34, %v652_v47 }
 0x5cd   :  { %v661_v51 = vsel %vm658_vm6, %v660_v48, %v656_v49 }
 0x5ce   :  { %v664_v53 = vmul.f32 %v663_v50, %v661_v51 }
 0x5d0   :  { %v665_v56 = vadd.f32 %v664_v53, %v253_v52 }
 0x5d2   :  { %1170 = vtanh.f32 %v665_v56 }
 0x5d8   :  { %v1171_v59 = vpop.eup %1170 }
 0x5d9   :  { %v667_v60 = vsub.f32 %v588_v6, %v1171_v59 }
 0x5db   :  { %669 = vrot.lane.b32.xlu0 %v667_v60, %s1278_s7 }
 0x64d   :  { %v670_v61 = vpop.permute.xlu0 %669 }
 0x64e   :  { %v672_v62 = vmul.f32 %v670_v61, %v661_v51 }
 0x650   :  { %674 = vrot.lane.b32.xlu1 %v672_v62, %s1278_s7 }
 0x6c2   :  { %v675_v63 = vpop.permute.xlu1 %674 }
 0x6c3   :  { %v677_v0 = vadd.f32 %v1171_v59, %v675_v63 }
 0x6c5   :  { %v702_v3 = vpack.c.bf16 %v677_v0, %v677_v0  ;;  %1120 = vmatmul.msk.f32.vlgmr.msrb.gmra.mxu3 %vm346_vm4, %v677_v0 }
 0x6c6   :  { %901 = vmatpush.bf16.msrb.mxu3 %v1342_v44 }
 0x6c7   :  { %1121 = vmatmul.msk.bf16.vlgmr.msrb.gmra.mxu0 %vm346_vm4, %v702_v3  ;;  %1122 = vmatmul.msk.bf16.vlgmr.msrb.gmra.mxu1 %vm346_vm4, %v702_v3  ;;  %v259_v3 = vadd.f32 %v1588_v14, %v1386_v17 }
 0x6c8   :  { %956 = vmatpush.msrb.mxu0 %v1402_v35  ;;  %977 = vmatpush.bf16.msrb.mxu1 %v1321_v20  ;;  %v215_v20 = vadd.f32 %v1582_v10, %v1378_v2 }
 0x6ca   :  { %902 = vmatpush.bf16.msrb.mxu3 %v1348_v54  ;;  %957 = vmatpush.msrb.mxu0 %v1407_v36 }
 0x6cc   :  { %958 = vmatpush.msrb.mxu0 %v1414_v26  ;;  %978 = vmatpush.bf16.msrb.mxu1 %v1325_v21 }
 0x6ce   :  { %903 = vmatpush.bf16.msrb.mxu3 %v1354_v55  ;;  %959 = vmatpush.msrb.mxu0 %v1425_v38 }
 0x6d0   :  { %960 = vmatpush.msrb.mxu0 %v1434_v39  ;;  %979 = vmatpush.bf16.msrb.mxu1 %v1329_v24 }
 0x6d2   :  { %904 = vmatpush.bf16.msrb.mxu3 %v1360_v57  ;;  %961 = vmatpush.msrb.mxu0 %v1441_v40 }
 0x6d4   :  { %962 = vmatpush.msrb.mxu0 %v1449_v41  ;;  %980 = vmatpush.bf16.msrb.mxu1 %v1335_v27 }
 0x6d6   :  { %963 = vmatpush.msrb.mxu0 %v1460_v43 }
 0x744   :  { %v715_v21 = vpop.f32.mrf.mxu0  ;;  %v728_v9 = vpop.f32.mrf.mxu1 }
 0x745   :  { %v732_v4 = vadd.f32 %v715_v21, %v215_v20  ;;  %v752_v34 = vadd.f32 %v1384_v12, %v728_v9 }
 0x747   :  { %v1123_v6 = vmul.f32 -1.442695, %v732_v4 }
 0x748   :  { %v698_v1 = vpop.f32.mrf.mxu3 }
 0x749   :  { %1172 = vpow2.f32 %v1123_v6  ;;  %v699_v24 = vadd.f32 %v1545_v19, %v698_v1 }
 0x74b   :  { %701 = vst [vmem:[#allocation7 + $0x18] sm:$0xff] %v699_v24 }
 0x74c   :  { %v717_v5 = vpop.f32.mrf.mxu0  ;;  %v730_v7 = vpop.f32.mrf.mxu1 }
 0x74f   :  { %v1173_v58 = vpop.eup %1172 }
 0x750   :  { %v736_v23 = vadd.f32 1.0, %v1173_v58 }
 0x752   :  { %1174 = vrcp.f32 %v736_v23  ;;  %v748_v29 = vand.u32 2147483648, %v736_v23  ;;  %v746_v10 = vand.u32 2147483647, %v736_v23  ;;  %vm742_vm8 = vweird.f32 %v736_v23 }
 0x754   :  { %v749_v32 = vor.u32 1.1754944e-38, %v748_v29  ;;  %vm747_vm10 = vcmp.eq.f32.partialorder %v746_v10, 8.507059e+37 }
 0x758   :  { %v1175_v27 = vpop.eup %1174 }
 0x759   :  { %v738_v25 = vmul.f32 %v1175_v27, %v736_v23  ;;  %vm743_vm7 = vweird.f32 %v1175_v27  ;;  %v221_v23 = vadd.f32 %v1590_v15, %v1378_v2 }
 0x75a   :  { %vm744_vm9 = vmor %vm742_vm8, %vm743_vm7 }
 0x75b   :  { %v739_v28 = vsub.f32 1.0, %v738_v25 }
 0x75d   :  { %v740_v30 = vmul.f32 %v1175_v27, %v739_v28 }
 0x75f   :  { %v741_v31 = vadd.f32 %v1175_v27, %v740_v30 }
 0x761   :  { %v745_v33 = vsel %vm744_vm9, %v1175_v27, %v741_v31 }
 0x762   :  { %v750_v37 = vsel %vm747_vm10, %v749_v32, %v745_v33 }
 0x763   :  { %v753_v45 = vmul.f32 %v752_v34, %v750_v37 }
 0x765   :  { %v754_v46 = vadd.f32 %v753_v45, %v256_v42 }
 0x767   :  { %1176 = vtanh.f32 %v754_v46 }
 0x76d   :  { %v1177_v8 = vpop.eup %1176 }
 0x76e   :  { %v756_v47 = vsub.f32 %v677_v0, %v1177_v8 }
 0x770   :  { %758 = vrot.lane.b32.xlu2 %v756_v47, %s1278_s7 }
 0x7ca   :  { %v759_v48 = vpop.permute.xlu2 %758 }
 0x7cb   :  { %v761_v49 = vmul.f32 %v759_v48, %v750_v37 }
 0x7cd   :  { %763 = vrot.lane.b32.xlu0 %v761_v49, %s1278_s7 }
 0x83f   :  { %v764_v50 = vpop.permute.xlu0 %763 }
 0x840   :  { %v766_v51 = vadd.f32 %v1177_v8, %v764_v50  ;;  %v262_v50 = vadd.f32 %v1592_v16, %v1386_v17 }
 0x842   :  { %v791_v52 = vpack.c.bf16 %v766_v51, %v766_v51  ;;  %1124 = vmatmul.msk.f32.vlgmr.msrb.gmra.mxu2 %vm346_vm4, %v766_v51 }
 0x843   :  { %990 = vmatpush.bf16.msrb.mxu2 %v1342_v44 }
 0x844   :  { %1125 = vmatmul.msk.bf16.vlgmr.msra.gmra.mxu3 %vm346_vm4, %v791_v52  ;;  %1126 = vmatmul.msk.bf16.vlgmr.msra.gmra.mxu0 %vm346_vm4, %v791_v52 }
 0x845   :  { %1045 = vmatpush.msra.mxu3 %v1402_v35  ;;  %v218_v35 = vadd.f32 %v1586_v13, %v1378_v2 }
 0x847   :  { %991 = vmatpush.bf16.msrb.mxu2 %v1348_v54  ;;  %1046 = vmatpush.msra.mxu3 %v1407_v36 }
 0x849   :  { %1047 = vmatpush.msra.mxu3 %v1414_v26 }
 0x84b   :  { %992 = vmatpush.bf16.msrb.mxu2 %v1354_v55  ;;  %1048 = vmatpush.msra.mxu3 %v1425_v38 }
 0x84d   :  { %1049 = vmatpush.msra.mxu3 %v1434_v39 }
 0x84f   :  { %993 = vmatpush.bf16.msrb.mxu2 %v1360_v57  ;;  %1050 = vmatpush.msra.mxu3 %v1441_v40 }
 0x851   :  { %1051 = vmatpush.msra.mxu3 %v1449_v41 }
 0x853   :  { %1052 = vmatpush.msra.mxu3 %v1460_v43 }
 0x8c1   :  { %v817_v44 = vpop.f32.mrf.mxu0 }
 0x8c2   :  { %v841_v62 = vadd.f32 %v1384_v12, %v817_v44 }
 0x8c5   :  { %v787_v54 = vpop.f32.mrf.mxu2 }
 0x8c6   :  { %v788_v36 = vadd.f32 %v1545_v19, %v787_v54 }
 0x8c7   :  { %v804_v55 = vpop.f32.mrf.mxu3 }
 0x8c8   :  { %790 = vst [vmem:[#allocation7 + $0x20] sm:$0xff] %v788_v36  ;;  %v821_v26 = vadd.f32 %v804_v55, %v218_v35 }
 0x8c9   :  { %v819_v38 = vpop.f32.mrf.mxu0 }
 0x8ca   :  { %v1127_v39 = vmul.f32 -1.442695, %v821_v26 }
 0x8cc   :  { %1178 = vpow2.f32 %v1127_v39  ;;  %v224_v39 = vadd.f32 %v1594_v18, %v1378_v2 }
 0x8cf   :  { %v806_v57 = vpop.f32.mrf.mxu3 }
 0x8d2   :  { %v1179_v11 = vpop.eup %1178 }
 0x8d3   :  { %v825_v40 = vadd.f32 1.0, %v1179_v11 }
 0x8d5   :  { %1180 = vrcp.f32 %v825_v40  ;;  %v837_v56 = vand.u32 2147483648, %v825_v40  ;;  %v835_v60 = vand.u32 2147483647, %v825_v40  ;;  %vm831_vm12 = vweird.f32 %v825_v40 }
 0x8d7   :  { %v838_v61 = vor.u32 1.1754944e-38, %v837_v56  ;;  %vm836_vm14 = vcmp.eq.f32.partialorder %v835_v60, 8.507059e+37 }
 0x8db   :  { %v1181_v41 = vpop.eup %1180 }
 0x8dc   :  { %v827_v53 = vmul.f32 %v1181_v41, %v825_v40  ;;  %vm832_vm11 = vweird.f32 %v1181_v41 }
 0x8dd   :  { %vm833_vm13 = vmor %vm831_vm12, %vm832_vm11 }
 0x8de   :  { %v828_v43 = vsub.f32 1.0, %v827_v53 }
 0x8e0   :  { %v829_v59 = vmul.f32 %v1181_v41, %v828_v43 }
 0x8e2   :  { %v830_v13 = vadd.f32 %v1181_v41, %v829_v59 }
 0x8e4   :  { %v834_v63 = vsel %vm833_vm13, %v1181_v41, %v830_v13 }
 0x8e5   :  { %v839_v0 = vsel %vm836_vm14, %v838_v61, %v834_v63 }
 0x8e6   :  { %v842_v20 = vmul.f32 %v841_v62, %v839_v0 }
 0x8e8   :  { %v843_v21 = vadd.f32 %v842_v20, %v259_v3 }
 0x8ea   :  { %1182 = vtanh.f32 %v843_v21 }
 0x8f0   :  { %v1183_v9 = vpop.eup %1182 }
 0x8f1   :  { %v845_v4 = vsub.f32 %v766_v51, %v1183_v9 }
 0x8f3   :  { %847 = vrot.lane.b32.xlu1 %v845_v4, %s1278_s7  ;;  %v265_v4 = vadd.f32 %v1596_v22, %v1386_v17 }
 0x965   :  { %v848_v6 = vpop.permute.xlu1 %847 }
 0x966   :  { %v850_v1 = vmul.f32 %v848_v6, %v839_v0 }
 0x968   :  { %852 = vrot.lane.b32.xlu2 %v850_v1, %s1278_s7 }
 0x9c2   :  { %v853_v24 = vpop.permute.xlu2 %852 }
 0x9c3   :  { %v855_v5 = vadd.f32 %v1183_v9, %v853_v24 }
 0x9c5   :  { %v880_v7 = vpack.c.bf16 %v855_v5, %v855_v5  ;;  %1128 = vmatmul.msk.f32.vlgmr.msra.gmra.mxu1 %vm346_vm4, %v855_v5 }
 0x9c7   :  { %1129 = vmatmul.msk.bf16.vlgmr.msra.gmra.mxu2 %vm346_vm4, %v880_v7  ;;  %1130 = vmatmul.msk.bf16.vlgmr.msrb.gmra.mxu3 %vm346_vm4, %v880_v7 }
 0xa42   :  { %v876_v14 = vpop.f32.mrf.mxu1 }
 0xa43   :  { %v877_v58 = vadd.f32 %v1545_v19, %v876_v14 }
 0xa45   :  { %879 = vst [vmem:[#allocation7 + $0x28] sm:$0xff] %v877_v58 }
 0xa4a   :  { %v893_v27 = vpop.f32.mrf.mxu2  ;;  %v906_v25 = vpop.f32.mrf.mxu3 }
 0xa4b   :  { %v910_v28 = vadd.f32 %v893_v27, %v221_v23  ;;  %v930_v48 = vadd.f32 %v1384_v12, %v906_v25 }
 0xa4d   :  { %v1131_v29 = vmul.f32 -1.442695, %v910_v28 }
 0xa4f   :  { %1184 = vpow2.f32 %v1131_v29 }
 0xa52   :  { %v895_v30 = vpop.f32.mrf.mxu2  ;;  %v908_v10 = vpop.f32.mrf.mxu3 }
 0xa55   :  { %v1185_v31 = vpop.eup %1184 }
 0xa56   :  { %v914_v32 = vadd.f32 1.0, %v1185_v31 }
 0xa58   :  { %1186 = vrcp.f32 %v914_v32  ;;  %v926_v42 = vand.u32 2147483648, %v914_v32  ;;  %v924_v46 = vand.u32 2147483647, %v914_v32  ;;  %vm920_vm0 = vweird.f32 %v914_v32 }
 0xa5a   :  { %v927_v15 = vor.u32 1.1754944e-38, %v926_v42  ;;  %vm925_vm2 = vcmp.eq.f32.partialorder %v924_v46, 8.507059e+37 }
 0xa5e   :  { %v1187_v33 = vpop.eup %1186 }
 0xa5f   :  { %v916_v34 = vmul.f32 %v1187_v33, %v914_v32  ;;  %vm921_vm15 = vweird.f32 %v1187_v33 }
 0xa60   :  { %vm922_vm1 = vmor %vm920_vm0, %vm921_vm15 }
 0xa61   :  { %v917_v37 = vsub.f32 1.0, %v916_v34 }
 0xa63   :  { %v918_v45 = vmul.f32 %v1187_v33, %v917_v37 }
 0xa65   :  { %v919_v8 = vadd.f32 %v1187_v33, %v918_v45 }
 0xa67   :  { %v923_v47 = vsel %vm922_vm1, %v1187_v33, %v919_v8 }
 0xa68   :  { %v928_v49 = vsel %vm925_vm2, %v927_v15, %v923_v47 }
 0xa69   :  { %v931_v51 = vmul.f32 %v930_v48, %v928_v49 }
 0xa6b   :  { %v932_v52 = vadd.f32 %v931_v51, %v262_v50 }
 0xa6d   :  { %1188 = vtanh.f32 %v932_v52 }
 0xa73   :  { %v1189_v44 = vpop.eup %1188 }
 0xa74   :  { %v934_v54 = vsub.f32 %v855_v5, %v1189_v44 }
 0xa76   :  { %936 = vrot.lane.b32.xlu0 %v934_v54, %s1278_s7 }
 0xae8   :  { %v937_v35 = vpop.permute.xlu0 %936 }
 0xae9   :  { %v939_v36 = vmul.f32 %v937_v35, %v928_v49 }
 0xaeb   :  { %941 = vrot.lane.b32.xlu1 %v939_v36, %s1278_s7 }
 0xb5d   :  { %v942_v55 = vpop.permute.xlu1 %941 }
 0xb5e   :  { %v944_v26 = vadd.f32 %v1189_v44, %v942_v55 }
 0xb60   :  { %v969_v38 = vpack.c.bf16 %v944_v26, %v944_v26  ;;  %1132 = vmatmul.msk.f32.vlgmr.msrb.gmra.mxu0 %vm346_vm4, %v944_v26 }
 0xb62   :  { %1133 = vmatmul.msk.bf16.vlgmr.msrb.gmra.mxu1 %vm346_vm4, %v969_v38  ;;  %1134 = vmatmul.msk.bf16.vlgmr.msrb.gmra.mxu2 %vm346_vm4, %v969_v38 }
 0xbdd   :  { %v965_v16 = vpop.f32.mrf.mxu0 }
 0xbde   :  { %v966_v57 = vadd.f32 %v1545_v19, %v965_v16 }
 0xbdf   :  { %v982_v11 = vpop.f32.mrf.mxu1 }
 0xbe0   :  { %968 = vst [vmem:[#allocation7 + $0x30] sm:$0xff] %v966_v57  ;;  %v999_v40 = vadd.f32 %v982_v11, %v224_v39 }
 0xbe2   :  { %v1135_v41 = vmul.f32 -1.442695, %v999_v40 }
 0xbe4   :  { %1190 = vpow2.f32 %v1135_v41 }
 0xbe5   :  { %v995_v53 = vpop.f32.mrf.mxu2 }
 0xbe6   :  { %v1019_v21 = vadd.f32 %v1384_v12, %v995_v53 }
 0xbe7   :  { %v984_v43 = vpop.f32.mrf.mxu1 }
 0xbea   :  { %v1191_v56 = vpop.eup %1190 }
 0xbeb   :  { %v1003_v59 = vadd.f32 1.0, %v1191_v56 }
 0xbed   :  { %1192 = vrcp.f32 %v1003_v59  ;;  %v997_v60 = vpop.f32.mrf.mxu2  ;;  %v1015_v63 = vand.u32 2147483648, %v1003_v59  ;;  %v1013_v2 = vand.u32 2147483647, %v1003_v59  ;;  %vm1009_vm5 = vweird.f32 %v1003_v59 }
 0xbef   :  { %v1016_v3 = vor.u32 1.1754944e-38, %v1015_v63  ;;  %vm1014_vm7 = vcmp.eq.f32.partialorder %v1013_v2, 8.507059e+37 }
 0xbf3   :  { %v1193_v13 = vpop.eup %1192 }
 0xbf4   :  { %v1005_v61 = vmul.f32 %v1193_v13, %v1003_v59  ;;  %vm1010_vm3 = vweird.f32 %v1193_v13 }
 0xbf5   :  { %vm1011_vm6 = vmor %vm1009_vm5, %vm1010_vm3 }
 0xbf6   :  { %v1006_v62 = vsub.f32 1.0, %v1005_v61 }
 0xbf8   :  { %v1007_v0 = vmul.f32 %v1193_v13, %v1006_v62 }
 0xbfa   :  { %v1008_v18 = vadd.f32 %v1193_v13, %v1007_v0 }
 0xbfc   :  { %v1012_v20 = vsel %vm1011_vm6, %v1193_v13, %v1008_v18 }
 0xbfd   :  { %v1017_v9 = vsel %vm1014_vm7, %v1016_v3, %v1012_v20 }
 0xbfe   :  { %v1020_v6 = vmul.f32 %v1019_v21, %v1017_v9 }
 0xc00   :  { %v1021_v1 = vadd.f32 %v1020_v6, %v265_v4 }
 0xc02   :  { %1194 = vtanh.f32 %v1021_v1 }
 0xc08   :  { %v1195_v24 = vpop.eup %1194 }
 0xc09   :  { %v1023_v5 = vsub.f32 %v944_v26, %v1195_v24 }
 0xc0b   :  { %1025 = vrot.lane.b32.xlu2 %v1023_v5, %s1278_s7 }
 0xc65   :  { %v1026_v7 = vpop.permute.xlu2 %1025 }
 0xc66   :  { %v1028_v14 = vmul.f32 %v1026_v7, %v1017_v9 }
 0xc68   :  { %1030 = vrot.lane.b32.xlu0 %v1028_v14, %s1278_s7 }
 0xcda   :  { %v1031_v58 = vpop.permute.xlu0 %1030 }
 0xcdb   :  { %v1033_v23 = vadd.f32 %v1195_v24, %v1031_v58 }
 0xcdd   :  { %1136 = vmatmul.msk.f32.vlgmr.msra.gmra.mxu3 %vm346_vm4, %v1033_v23 }
 0xd60   :  { %v1054_v12 = vpop.f32.mrf.mxu3 }
 0xd61   :  { %v1055_v17 = vadd.f32 %v1545_v19, %v1054_v12 }
 0xd63   :  { %1057 = vst [vmem:[#allocation7 + $0x38] sm:$0xff] %v1055_v17 }
 0xd64   :  { %1070 = dma.vmem_to_hbm [thread:$0]  %s1063_s12, 1024, %s1065_s15, [#allocation4], %s1280_s16, %s1280_s16, %s1281_s17  }
 0xd65   :  { %1272 = dma.done.wait [#allocation4], 1024  }
 0xd66   :  { %1273 = vsyncadd [#allocation4], 4294966272 }
 0xd67   :  { %1075 = vsyncpa [#allocation3], 1 }
 0xd68   :  { %1076 = vsyncpa [#allocation6], 1 }
 0xd69   :  { %1077 = vsyncpa [#allocation4], 1 }

</bundles_post_ra>
